<compile_context>
chip_gen: v7x
topology: tpu7x:2x2x1
jax: 0.10.0
libtpu: 0.0.40
codegen_flags: <defaults>
</compile_context>

<pallas_src>
import functools

import jax
import jax.numpy as jnp
from jax.experimental import pallas as pl
from jax.experimental.pallas import tpu as pltpu

HIDDEN = 512
TARGET_TM = 512  # target rows per grid step for large batches


def _round_up(n, m):
    return ((n + m - 1) // m) * m


# --------------------------------------------------------------------------------------
# Fused MLP kernel: x -> (Linear+ReLU) x3 -> fused (out1|out2) head
# All matmul operands are bf16; accumulation and bias-add/ReLU are f32.
# --------------------------------------------------------------------------------------
def _fused_mlp_kernel(x_ref, w1_ref, b1_ref, w2_ref, b2_ref, w3_ref, b3_ref,
                      wh_ref, bh_ref, o_ref):
    h = jnp.dot(x_ref[...].astype(jnp.bfloat16), w1_ref[...],
                preferred_element_type=jnp.float32) + b1_ref[...]
    h = jnp.maximum(h, 0.0).astype(jnp.bfloat16)
    h = jnp.dot(h, w2_ref[...], preferred_element_type=jnp.float32) + b2_ref[...]
    h = jnp.maximum(h, 0.0).astype(jnp.bfloat16)
    h = jnp.dot(h, w3_ref[...], preferred_element_type=jnp.float32) + b3_ref[...]
    h = jnp.maximum(h, 0.0).astype(jnp.bfloat16)
    o_ref[...] = jnp.dot(h, wh_ref[...], preferred_element_type=jnp.float32) + bh_ref[...]


def global_encoder_forward(kparams, x, latent_dim):
    """x: (M, input_dim) float32. Returns (mu, logvar), each (M, latent_dim) float32."""
    M, K = x.shape
    head_n = kparams["wh"].shape[1]  # 2*latent_dim padded up to a multiple of 128

    if M <= 8:
        # Tiny batch: single full block, one grid step.
        num_tiles, tm, m_pad = 1, M, M
        x_in = x
    else:
        # >=2 row tiles so the "parallel" axis can shard across v7x's 2 TensorCores;
        # tile size targets 512 rows to amortize per-step pipeline overhead.
        num_tiles = max(2, pl.cdiv(M, TARGET_TM))
        tm = _round_up(pl.cdiv(M, num_tiles), 8)
        m_pad = num_tiles * tm
        x_in = jnp.pad(x, ((0, m_pad - M), (0, 0))) if m_pad != M else x

    out = pl.pallas_call(
        _fused_mlp_kernel,
        out_shape=jax.ShapeDtypeStruct((m_pad, head_n), jnp.float32),
        grid=(num_tiles,),
        in_specs=[
            pl.BlockSpec((tm, K), lambda i: (i, 0)),             # activations: row-tiled
            pl.BlockSpec((K, HIDDEN), lambda i: (0, 0)),         # weights/biases: constant
            pl.BlockSpec((1, HIDDEN), lambda i: (0, 0)),         #   index -> fetched once
            pl.BlockSpec((HIDDEN, HIDDEN), lambda i: (0, 0)),
            pl.BlockSpec((1, HIDDEN), lambda i: (0, 0)),
            pl.BlockSpec((HIDDEN, HIDDEN), lambda i: (0, 0)),
            pl.BlockSpec((1, HIDDEN), lambda i: (0, 0)),
            pl.BlockSpec((HIDDEN, head_n), lambda i: (0, 0)),
            pl.BlockSpec((1, head_n), lambda i: (0, 0)),
        ],
        out_specs=pl.BlockSpec((tm, head_n), lambda i: (i, 0)),
        compiler_params=pltpu.CompilerParams(
            dimension_semantics=("parallel",),  # row tiles are independent
        ),
    )(x_in, kparams["w1"], kparams["b1"], kparams["w2"], kparams["b2"],
      kparams["w3"], kparams["b3"], kparams["wh"], kparams["bh"])

    mu = out[:M, :latent_dim]
    logvar = out[:M, latent_dim:2 * latent_dim]
    return mu, logvar


# --------------------------------------------------------------------------------------
# Parameters
# --------------------------------------------------------------------------------------
def init_params(key, input_dim, latent_dim):
    """PyTorch-equivalent f32 parameters, weights stored in (K, N) matmul orientation.

    Heads are kept SEPARATE (out1 / out2) like the original nn.Module; fusion/padding
    for the kernel happens in prepare_kernel_params.
    """
    ks = jax.random.split(key, 10)

    def uniform(k, shape, fan_in):
        bound = 1.0 / jnp.sqrt(fan_in)
        return jax.random.uniform(k, shape, jnp.float32, -bound, bound)

    return {
        "w1": uniform(ks[0], (input_dim, HIDDEN), input_dim),
        "b1": uniform(ks[1], (HIDDEN,), input_dim),
        "w2": uniform(ks[2], (HIDDEN, HIDDEN), HIDDEN),
        "b2": uniform(ks[3], (HIDDEN,), HIDDEN),
        "w3": uniform(ks[4], (HIDDEN, HIDDEN), HIDDEN),
        "b3": uniform(ks[5], (HIDDEN,), HIDDEN),
        "w_out1": uniform(ks[6], (HIDDEN, latent_dim), HIDDEN),
        "b_out1": uniform(ks[7], (latent_dim,), HIDDEN),
        "w_out2": uniform(ks[8], (HIDDEN, latent_dim), HIDDEN),
        "b_out2": uniform(ks[9], (latent_dim,), HIDDEN),
    }


def prepare_kernel_params(p, latent_dim):
    """bf16 weights, f32 biases as (1, N) rows, out1|out2 fused into a 128-lane-padded head."""
    head_n = max(128, _round_up(2 * latent_dim, 128))

    wh = jnp.zeros((HIDDEN, head_n), jnp.float32)
    wh = wh.at[:, :latent_dim].set(p["w_out1"])
    wh = wh.at[:, latent_dim:2 * latent_dim].set(p["w_out2"])
    bh = jnp.zeros((1, head_n), jnp.float32)
    bh = bh.at[0, :latent_dim].set(p["b_out1"])
    bh = bh.at[0, latent_dim:2 * latent_dim].set(p["b_out2"])

    return {
        "w1": p["w1"].astype(jnp.bfloat16),
        "b1": p["b1"].reshape(1, HIDDEN),
        "w2": p["w2"].astype(jnp.bfloat16),
        "b2": p["b2"].reshape(1, HIDDEN),
        "w3": p["w3"].astype(jnp.bfloat16),
        "b3": p["b3"].reshape(1, HIDDEN),
        "wh": wh.astype(jnp.bfloat16),
        "bh": bh,
    }


# Pure-JAX f32 reference of the PyTorch GlobalEncoder.forward (separate out1/out2 heads).
def reference_forward(p, x):
    h = jnp.maximum(x @ p["w1"] + p["b1"], 0.0)
    h = jnp.maximum(h @ p["w2"] + p["b2"], 0.0)
    h = jnp.maximum(h @ p["w3"] + p["b3"], 0.0)
    return h @ p["w_out1"] + p["b_out1"], h @ p["w_out2"] + p["b_out2"]


# --------------------------------------------------------------------------------------
if __name__ == "__main__":
    input_dim = 64
    latent_dim = 32

    key = jax.random.PRNGKey(0)
    k_param, k_x1, k_x2 = jax.random.split(key, 3)
    params = init_params(k_param, input_dim, latent_dim)
    kparams = prepare_kernel_params(params, latent_dim)

    fwd = jax.jit(functools.partial(global_encoder_forward, latent_dim=latent_dim))

    # Tolerance is loosened vs the pure-f32 reference because the kernel uses bf16
    # operands (with f32 accumulation).
    ATOL = RTOL = 5e-2

    # 1) Tiny batch: exercises the single-block path.
    batch = 2
    x = jax.random.normal(k_x1, (batch, input_dim), jnp.float32)
    mu, logvar = fwd(kparams, x)
    jax.block_until_ready((mu, logvar))
    assert mu.shape == (batch, latent_dim) and logvar.shape == (batch, latent_dim)
    mu_ref, lv_ref = reference_forward(params, x)
    assert jnp.allclose(mu, mu_ref, atol=ATOL, rtol=RTOL)
    assert jnp.allclose(logvar, lv_ref, atol=ATOL, rtol=RTOL)

    # 2) Mid batch (non-multiple of the tile): exercises the 2-tile parallel grid + tail pad.
    batch2 = 40
    x2 = jax.random.normal(k_x2, (batch2, input_dim), jnp.float32)
    mu2, logvar2 = fwd(kparams, x2)
    jax.block_until_ready((mu2, logvar2))
    assert mu2.shape == (batch2, latent_dim) and logvar2.shape == (batch2, latent_dim)
    mu2_ref, lv2_ref = reference_forward(params, x2)
    assert jnp.allclose(mu2, mu2_ref, atol=ATOL, rtol=RTOL)
    assert jnp.allclose(logvar2, lv2_ref, atol=ATOL, rtol=RTOL)

    print("KERNEL_OK")
</pallas_src>

<mosaic_0001>
module attributes {stable_mosaic.version = 11 : i64} {
  func.func @_fused_mlp_kernel(%arg0: i32, %arg1: memref<2x64xf32, #tpu.memory_space<vmem>>, %arg2: memref<64x512xbf16, #tpu.memory_space<vmem>>, %arg3: memref<1x512xf32, #tpu.memory_space<vmem>>, %arg4: memref<512x512xbf16, #tpu.memory_space<vmem>>, %arg5: memref<1x512xf32, #tpu.memory_space<vmem>>, %arg6: memref<512x512xbf16, #tpu.memory_space<vmem>>, %arg7: memref<1x512xf32, #tpu.memory_space<vmem>>, %arg8: memref<512x128xbf16, #tpu.memory_space<vmem>>, %arg9: memref<1x128xf32, #tpu.memory_space<vmem>>, %arg10: memref<2x128xf32, #tpu.memory_space<vmem>>) attributes {dimension_semantics = [#tpu.dimension_semantics<parallel>], iteration_bounds = array<i64: 1>, scalar_prefetch = 0 : i64, scratch_operands = 0 : i64, tpu.core_type = #tpu.core_type<tc>, window_params = [{transform_indices = @transform_0, window_bounds = array<i64: 2, 64>}, {pipeline_mode = #tpu.pipeline_mode<synchronous>, transform_indices = @transform_1, window_bounds = array<i64: 64, 512>}, {pipeline_mode = #tpu.pipeline_mode<synchronous>, transform_indices = @transform_2, window_bounds = array<i64: 1, 512>}, {pipeline_mode = #tpu.pipeline_mode<synchronous>, transform_indices = @transform_3, window_bounds = array<i64: 512, 512>}, {pipeline_mode = #tpu.pipeline_mode<synchronous>, transform_indices = @transform_4, window_bounds = array<i64: 1, 512>}, {pipeline_mode = #tpu.pipeline_mode<synchronous>, transform_indices = @transform_5, window_bounds = array<i64: 512, 512>}, {pipeline_mode = #tpu.pipeline_mode<synchronous>, transform_indices = @transform_6, window_bounds = array<i64: 1, 512>}, {pipeline_mode = #tpu.pipeline_mode<synchronous>, transform_indices = @transform_7, window_bounds = array<i64: 512, 128>}, {pipeline_mode = #tpu.pipeline_mode<synchronous>, transform_indices = @transform_8, window_bounds = array<i64: 1, 128>}, {transform_indices = @transform_9, window_bounds = array<i64: 2, 128>}]} {
    %c0 = arith.constant 0 : index
    %c0_0 = arith.constant 0 : index
    %0 = vector.load %arg1[%c0, %c0_0] : memref<2x64xf32, #tpu.memory_space<vmem>>, vector<2x64xf32>
    %1 = arith.truncf %0 : vector<2x64xf32> to vector<2x64xbf16>
    %c0_1 = arith.constant 0 : index
    %c0_2 = arith.constant 0 : index
    %2 = vector.load %arg2[%c0_1, %c0_2] : memref<64x512xbf16, #tpu.memory_space<vmem>>, vector<64x512xbf16>
    %cst = arith.constant dense<0.000000e+00> : vector<2x512xf32>
    %3 = tpu.matmul %1, %2, %cst {dimension_numbers = #tpu.dot_dimension_numbers<[1], [0], [0], [1], [0, 0, 1, 1], [], []>} : vector<2x64xbf16>, vector<64x512xbf16>, vector<2x512xf32> -> vector<2x512xf32>
    %c0_3 = arith.constant 0 : index
    %c0_4 = arith.constant 0 : index
    %4 = vector.load %arg3[%c0_3, %c0_4] : memref<1x512xf32, #tpu.memory_space<vmem>>, vector<1x512xf32>
    %5 = vector.broadcast %4 : vector<1x512xf32> to vector<2x512xf32>
    %6 = arith.addf %3, %5 : vector<2x512xf32>
    %cst_5 = arith.constant 0.000000e+00 : f32
    %7 = vector.broadcast %cst_5 : f32 to vector<2x512xf32>
    %8 = arith.maximumf %6, %7 : vector<2x512xf32>
    %9 = arith.truncf %8 : vector<2x512xf32> to vector<2x512xbf16>
    %c0_6 = arith.constant 0 : index
    %c0_7 = arith.constant 0 : index
    %10 = vector.load %arg4[%c0_6, %c0_7] : memref<512x512xbf16, #tpu.memory_space<vmem>>, vector<512x512xbf16>
    %cst_8 = arith.constant dense<0.000000e+00> : vector<2x512xf32>
    %11 = tpu.matmul %9, %10, %cst_8 {dimension_numbers = #tpu.dot_dimension_numbers<[1], [0], [0], [1], [0, 0, 1, 1], [], []>} : vector<2x512xbf16>, vector<512x512xbf16>, vector<2x512xf32> -> vector<2x512xf32>
    %c0_9 = arith.constant 0 : index
    %c0_10 = arith.constant 0 : index
    %12 = vector.load %arg5[%c0_9, %c0_10] : memref<1x512xf32, #tpu.memory_space<vmem>>, vector<1x512xf32>
    %13 = vector.broadcast %12 : vector<1x512xf32> to vector<2x512xf32>
    %14 = arith.addf %11, %13 : vector<2x512xf32>
    %cst_11 = arith.constant 0.000000e+00 : f32
    %15 = vector.broadcast %cst_11 : f32 to vector<2x512xf32>
    %16 = arith.maximumf %14, %15 : vector<2x512xf32>
    %17 = arith.truncf %16 : vector<2x512xf32> to vector<2x512xbf16>
    %c0_12 = arith.constant 0 : index
    %c0_13 = arith.constant 0 : index
    %18 = vector.load %arg6[%c0_12, %c0_13] : memref<512x512xbf16, #tpu.memory_space<vmem>>, vector<512x512xbf16>
    %cst_14 = arith.constant dense<0.000000e+00> : vector<2x512xf32>
    %19 = tpu.matmul %17, %18, %cst_14 {dimension_numbers = #tpu.dot_dimension_numbers<[1], [0], [0], [1], [0, 0, 1, 1], [], []>} : vector<2x512xbf16>, vector<512x512xbf16>, vector<2x512xf32> -> vector<2x512xf32>
    %c0_15 = arith.constant 0 : index
    %c0_16 = arith.constant 0 : index
    %20 = vector.load %arg7[%c0_15, %c0_16] : memref<1x512xf32, #tpu.memory_space<vmem>>, vector<1x512xf32>
    %21 = vector.broadcast %20 : vector<1x512xf32> to vector<2x512xf32>
    %22 = arith.addf %19, %21 : vector<2x512xf32>
    %cst_17 = arith.constant 0.000000e+00 : f32
    %23 = vector.broadcast %cst_17 : f32 to vector<2x512xf32>
    %24 = arith.maximumf %22, %23 : vector<2x512xf32>
    %25 = arith.truncf %24 : vector<2x512xf32> to vector<2x512xbf16>
    %c0_18 = arith.constant 0 : index
    %c0_19 = arith.constant 0 : index
    %26 = vector.load %arg8[%c0_18, %c0_19] : memref<512x128xbf16, #tpu.memory_space<vmem>>, vector<512x128xbf16>
    %cst_20 = arith.constant dense<0.000000e+00> : vector<2x128xf32>
    %27 = tpu.matmul %25, %26, %cst_20 {dimension_numbers = #tpu.dot_dimension_numbers<[1], [0], [0], [1], [0, 0, 1, 1], [], []>} : vector<2x512xbf16>, vector<512x128xbf16>, vector<2x128xf32> -> vector<2x128xf32>
    %c0_21 = arith.constant 0 : index
    %c0_22 = arith.constant 0 : index
    %28 = vector.load %arg9[%c0_21, %c0_22] : memref<1x128xf32, #tpu.memory_space<vmem>>, vector<1x128xf32>
    %29 = vector.broadcast %28 : vector<1x128xf32> to vector<2x128xf32>
    %30 = arith.addf %27, %29 : vector<2x128xf32>
    %c0_23 = arith.constant 0 : index
    %c0_24 = arith.constant 0 : index
    %31 = vector.load %arg10[%c0_23, %c0_24] : memref<2x128xf32, #tpu.memory_space<vmem>>, vector<2x128xf32>
    tpu.vector_store %arg10[%c0_23, %c0_24], %30 {strides = array<i32>} : memref<2x128xf32, #tpu.memory_space<vmem>>, vector<2x128xf32>,
    return
  }
  func.func @transform_0(%arg0: i32) -> (i32, i32) {
    %c0_i32 = arith.constant 0 : i32
    %c0_i32_0 = arith.constant 0 : i32
    return %arg0, %c0_i32 : i32, i32
  }
  func.func @transform_1(%arg0: i32) -> (i32, i32) {
    %c0_i32 = arith.constant 0 : i32
    %c0_i32_0 = arith.constant 0 : i32
    %c0_i32_1 = arith.constant 0 : i32
    return %c0_i32, %c0_i32_0 : i32, i32
  }
  func.func @transform_2(%arg0: i32) -> (i32, i32) {
    %c0_i32 = arith.constant 0 : i32
    %c0_i32_0 = arith.constant 0 : i32
    %c0_i32_1 = arith.constant 0 : i32
    return %c0_i32, %c0_i32_0 : i32, i32
  }
  func.func @transform_3(%arg0: i32) -> (i32, i32) {
    %c0_i32 = arith.constant 0 : i32
    %c0_i32_0 = arith.constant 0 : i32
    %c0_i32_1 = arith.constant 0 : i32
    return %c0_i32, %c0_i32_0 : i32, i32
  }
  func.func @transform_4(%arg0: i32) -> (i32, i32) {
    %c0_i32 = arith.constant 0 : i32
    %c0_i32_0 = arith.constant 0 : i32
    %c0_i32_1 = arith.constant 0 : i32
    return %c0_i32, %c0_i32_0 : i32, i32
  }
  func.func @transform_5(%arg0: i32) -> (i32, i32) {
    %c0_i32 = arith.constant 0 : i32
    %c0_i32_0 = arith.constant 0 : i32
    %c0_i32_1 = arith.constant 0 : i32
    return %c0_i32, %c0_i32_0 : i32, i32
  }
  func.func @transform_6(%arg0: i32) -> (i32, i32) {
    %c0_i32 = arith.constant 0 : i32
    %c0_i32_0 = arith.constant 0 : i32
    %c0_i32_1 = arith.constant 0 : i32
    return %c0_i32, %c0_i32_0 : i32, i32
  }
  func.func @transform_7(%arg0: i32) -> (i32, i32) {
    %c0_i32 = arith.constant 0 : i32
    %c0_i32_0 = arith.constant 0 : i32
    %c0_i32_1 = arith.constant 0 : i32
    return %c0_i32, %c0_i32_0 : i32, i32
  }
  func.func @transform_8(%arg0: i32) -> (i32, i32) {
    %c0_i32 = arith.constant 0 : i32
    %c0_i32_0 = arith.constant 0 : i32
    %c0_i32_1 = arith.constant 0 : i32
    return %c0_i32, %c0_i32_0 : i32, i32
  }
  func.func @transform_9(%arg0: i32) -> (i32, i32) {
    %c0_i32 = arith.constant 0 : i32
    %c0_i32_0 = arith.constant 0 : i32
    return %arg0, %c0_i32 : i32, i32
  }
}

</mosaic_0001>

<bundles_post_ra>
// kernel: global_encoder_forward.1
= control target key start
LH: loop header
LB: loop body
LE: loop exit
PB: predicated region body
PF: predicated region fallthrough
CT: control target
= control target key end

     0   :  { %14 = vsyncpa [#allocation3], 0  ;;  %s3767_s0 = inlined_call_operand.vmem [shape: f32[2,64], index: 0, kind: input, shape index: {}]   ;;  %s3768_s1 = inlined_call_operand.hbm [shape: bf16[64,512], index: 1, kind: input, shape index: {}]   ;;  %s3769_s2 = inlined_call_operand.hbm [shape: f32[1,512], index: 2, kind: input, shape index: {}]   ;;  %s3770_s3 = inlined_call_operand.hbm [shape: bf16[512,512], index: 3, kind: input, shape index: {}]   ;;  %s3771_s4 = inlined_call_operand.hbm [shape: f32[1,512], index: 4, kind: input, shape index: {}]   ;;  %s3772_s5 = inlined_call_operand.hbm [shape: bf16[512,512], index: 5, kind: input, shape index: {}]   ;;  %s3773_s6 = inlined_call_operand.vmem [shape: f32[1,512], index: 6, kind: input, shape index: {}]   ;;  %s3774_s7 = inlined_call_operand.hbm [shape: bf16[512,128], index: 7, kind: input, shape index: {}]   ;;  %s3775_s8 = inlined_call_operand.vmem [shape: f32[1,128], index: 8, kind: input, shape index: {}]   ;;  %s3776_s9 = inlined_call_operand.vmem [shape: f32[2,128], index: 9, kind: output, shape index: {}]  }
   0x1   :  { %15 = vsyncpa [#allocation5], 0 }
   0x2   :  { %16 = vsyncpa [#allocation8], 0 }
   0x3   :  { %17 = vsyncpa [#allocation11], 0  ;;  %s3567_s30 = smov [#allocation4]   ;;  %s3568_s11 = smov [#allocation7]  }
   0x4   :  { %s38_s10 = sshll.u32 %s3567_s30, 4  ;;  %s60_s12 = sshll.u32 %s3568_s11, 4  ;;  %s39_s10 = int_to_ptr.vmem [resolvable:$true] %s38_s10  ;;  %s61_s12 = int_to_ptr.vmem [resolvable:$true] %s60_s12 }
   0x5   :  { %s3427_s15 = scalar_lea.hbm %s3769_s2, 64 }
   0x6   :  { %p3428_p0 = scmp.ne.s32.totalorder %s3769_s2, %s3427_s15  ;;  %p3431_p1 = scmp.lt.u32.totalorder %s3427_s15, %s3769_s2 }
   0x8   :  { %p3433_p2 = pnand %p3431_p1, %p3428_p0 }
   0xa   :  { %3436 = shalt.err (!%p3433_p2)
}
   0xb   :  { %s3437_s20 = scalar_lea.vmem %s39_s10, 64  ;;  %p3442_p4 = scmp.lt.s32.totalorder %s39_s10, %s39_s10 }
   0xc   :  { %p3438_p3 = scmp.ne.s32.totalorder %s39_s10, %s3437_s20  ;;  %p3443_p5 = scmp.lt.s32.totalorder %s3437_s20, %s3437_s20 }
   0xe   :  { %p3444_p6 = por %p3443_p5, %p3442_p4 }
  0x10   :  { %p3445_p7 = pnand %p3444_p6, %p3438_p3 }
  0x12   :  { %3448 = shalt.err (!%p3445_p7)
}
  0x13   :  { %41 = dma.hbm_to_vmem [thread:$0]  %s3769_s2, 64, %s39_s10, [#allocation5]  }
  0x14   :  { %s3449_s25 = scalar_lea.hbm %s3771_s4, 64 }
  0x15   :  { %p3450_p8 = scmp.ne.s32.totalorder %s3771_s4, %s3449_s25  ;;  %p3453_p9 = scmp.lt.u32.totalorder %s3449_s25, %s3771_s4 }
  0x17   :  { %p3455_p10 = pnand %p3453_p9, %p3450_p8 }
  0x19   :  { %3458 = shalt.err (!%p3455_p10)
}
  0x1a   :  { %s3459_s30 = scalar_lea.vmem %s61_s12, 64  ;;  %p3464_p12 = scmp.lt.s32.totalorder %s61_s12, %s61_s12 }
  0x1b   :  { %p3460_p11 = scmp.ne.s32.totalorder %s61_s12, %s3459_s30  ;;  %p3465_p13 = scmp.lt.s32.totalorder %s3459_s30, %s3459_s30 }
  0x1d   :  { %p3466_p0 = por %p3465_p13, %p3464_p12 }
  0x1f   :  { %p3467_p1 = pnand %p3466_p0, %p3460_p11 }
  0x21   :  { %3470 = shalt.err (!%p3467_p1)
}
  0x22   :  { %63 = dma.hbm_to_vmem [thread:$0]  %s3771_s4, 64, %s61_s12, [#allocation8]  }
  0x23   :  { %s3569_s11 = smov [#allocation2]   ;;  %s3471_s16 = scalar_lea.hbm %s3768_s1, 2048 }
  0x24   :  { %s25_s13 = sshll.u32 %s3569_s11, 4  ;;  %p3472_p2 = scmp.ne.s32.totalorder %s3768_s1, %s3471_s16  ;;  %s26_s13 = int_to_ptr.vmem [resolvable:$true] %s25_s13 }
  0x25   :  { %p3475_p3 = scmp.lt.u32.totalorder %s3471_s16, %s3768_s1 }
  0x27   :  { %p3477_p4 = pnand %p3475_p3, %p3472_p2 }
  0x29   :  { %3480 = shalt.err (!%p3477_p4)
}
  0x2a   :  { %s3481_s21 = scalar_lea.vmem %s26_s13, 2048  ;;  %p3486_p6 = scmp.lt.s32.totalorder %s26_s13, %s26_s13 }
  0x2b   :  { %p3482_p5 = scmp.ne.s32.totalorder %s26_s13, %s3481_s21  ;;  %p3487_p7 = scmp.lt.s32.totalorder %s3481_s21, %s3481_s21 }
  0x2d   :  { %p3488_p8 = por %p3487_p7, %p3486_p6 }
  0x2f   :  { %p3489_p9 = pnand %p3488_p8, %p3482_p5 }
  0x31   :  { %3492 = shalt.err (!%p3489_p9)
}
  0x32   :  { %s3570_s4 = smov 256   ;;  %s3571_s12 = smov 16  }
  0x33   :  { %31 = dma.hbm_to_vmem [thread:$0]  %s3768_s1, 2048, %s26_s13, [#allocation3], %s3570_s4, %s3570_s4, %s3571_s12  }
  0x34   :  { %s3572_s24 = smov [#allocation6]   ;;  %s3573_s26 = smov [#allocation9]  }
  0x35   :  { %s47_s25 = sshll.u32 %s3572_s24, 4  ;;  %s69_s27 = sshll.u32 %s3573_s26, 4  ;;  %s48_s25 = int_to_ptr.vmem [resolvable:$true] %s47_s25  ;;  %s70_s27 = int_to_ptr.vmem [resolvable:$true] %s69_s27 }
  0x36   :  { %s3493_s30 = scalar_lea.hbm %s3770_s3, 16384 }
  0x37   :  { %p3494_p10 = scmp.ne.s32.totalorder %s3770_s3, %s3493_s30  ;;  %p3497_p11 = scmp.lt.u32.totalorder %s3493_s30, %s3770_s3 }
  0x39   :  { %p3499_p12 = pnand %p3497_p11, %p3494_p10 }
  0x3b   :  { %3502 = shalt.err (!%p3499_p12)
}
  0x3c   :  { %s3503_s1 = scalar_lea.vmem %s48_s25, 16384  ;;  %p3508_p0 = scmp.lt.s32.totalorder %s48_s25, %s48_s25 }
  0x3d   :  { %p3504_p13 = scmp.ne.s32.totalorder %s48_s25, %s3503_s1  ;;  %p3509_p1 = scmp.lt.s32.totalorder %s3503_s1, %s3503_s1 }
  0x3f   :  { %p3510_p2 = por %p3509_p1, %p3508_p0 }
  0x41   :  { %p3511_p3 = pnand %p3510_p2, %p3504_p13 }
  0x43   :  { %3514 = shalt.err (!%p3511_p3)
}
  0x44   :  { %53 = dma.hbm_to_vmem [thread:$0]  %s3770_s3, 16384, %s48_s25, [#allocation5], %s3570_s4, %s3570_s4, %s3571_s12  }
  0x45   :  { %s3515_s18 = scalar_lea.hbm %s3772_s5, 16384 }
  0x46   :  { %p3516_p4 = scmp.ne.s32.totalorder %s3772_s5, %s3515_s18  ;;  %p3519_p5 = scmp.lt.u32.totalorder %s3515_s18, %s3772_s5 }
  0x48   :  { %p3521_p6 = pnand %p3519_p5, %p3516_p4 }
  0x4a   :  { %3524 = shalt.err (!%p3521_p6)
}
  0x4b   :  { %s3525_s23 = scalar_lea.vmem %s70_s27, 16384  ;;  %p3530_p8 = scmp.lt.s32.totalorder %s70_s27, %s70_s27 }
  0x4c   :  { %p3526_p7 = scmp.ne.s32.totalorder %s70_s27, %s3525_s23  ;;  %p3531_p9 = scmp.lt.s32.totalorder %s3525_s23, %s3525_s23 }
  0x4e   :  { %p3532_p10 = por %p3531_p9, %p3530_p8 }
  0x50   :  { %p3533_p11 = pnand %p3532_p10, %p3526_p7 }
  0x52   :  { %3536 = shalt.err (!%p3533_p11)
}
  0x53   :  { %75 = dma.hbm_to_vmem [thread:$0]  %s3772_s5, 16384, %s70_s27, [#allocation8], %s3570_s4, %s3570_s4, %s3571_s12  }
  0x54   :  { %s3574_s25 = smov [#allocation10]   ;;  %s3537_s30 = scalar_lea.hbm %s3774_s7, 4096 }
  0x55   :  { %s83_s26 = sshll.u32 %s3574_s25, 4  ;;  %p3538_p12 = scmp.ne.s32.totalorder %s3774_s7, %s3537_s30  ;;  %s84_s26 = int_to_ptr.vmem [resolvable:$true] %s83_s26 }
  0x56   :  { %p3541_p13 = scmp.lt.u32.totalorder %s3537_s30, %s3774_s7 }
  0x58   :  { %p3543_p0 = pnand %p3541_p13, %p3538_p12 }
  0x5a   :  { %3546 = shalt.err (!%p3543_p0)
}
  0x5b   :  { %s3547_s1 = scalar_lea.vmem %s84_s26, 4096  ;;  %p3552_p2 = scmp.lt.s32.totalorder %s84_s26, %s84_s26 }
  0x5c   :  { %p3548_p1 = scmp.ne.s32.totalorder %s84_s26, %s3547_s1  ;;  %p3553_p3 = scmp.lt.s32.totalorder %s3547_s1, %s3547_s1 }
  0x5e   :  { %p3554_p4 = por %p3553_p3, %p3552_p2 }
  0x60   :  { %p3555_p5 = pnand %p3554_p4, %p3548_p1 }
  0x62   :  { %3558 = shalt.err (!%p3555_p5)
}
  0x63   :  { %s3575_s5 = smov 64   ;;  %s3576_s4 = smov 4  }
  0x64   :  { %89 = dma.hbm_to_vmem [thread:$0]  %s3774_s7, 4096, %s84_s26, [#allocation11], %s3575_s5, %s3575_s5, %s3576_s4  }
  0x65   :  { %3559 = dma.done.wait [#allocation3], 2048  }
  0x66   :  { %3560 = vsyncadd [#allocation3], 4294965248 }
  0x67   :  { %3561 = dma.done.wait [#allocation5], 16448  }
  0x68   :  { %3562 = vsyncadd [#allocation5], 4294950848 }
  0x69   :  { %3563 = dma.done.wait [#allocation8], 16448  }
  0x6a   :  { %3564 = vsyncadd [#allocation8], 4294950848 }
  0x6b   :  { %3565 = dma.done.wait [#allocation11], 4096  }
  0x6c   :  { %3566 = vsyncadd [#allocation11], 4294963200  ;;  %v3577_v0 = vmov 0   ;;  %v2987_v1 = vld [vmem:[#allocation2 + $0x4] ss:$16 sps:$4 sm:$0xff]   ;;  %vm231_vm0 = vcmask 523264  }
  0x6d   :  { %267 = vmatprep.mubr.bf16.mxu0 %v3577_v0  ;;  %308 = vmatprep.mubr.bf16.mxu1 %v3577_v0  ;;  %v2989_v2 = vld [vmem:[#allocation2] ss:$16 sps:$4 sm:$0xff]   ;;  %v2990_v3 = vld [vmem:[#allocation2 + $0x24] ss:$16 sps:$4 sm:$0xff]   ;;  %v2999_v7 = vld [vmem:[#allocation2 + $0xc] ss:$16 sps:$4 sm:$0xff]  }
  0x6e   :  { %235 = vmatprep.subr.bf16.mxu0 %v2987_v1  ;;  %v2992_v4 = vld [vmem:[#allocation2 + $0x20] ss:$16 sps:$4 sm:$0xff]   ;;  %v2993_v5 = vld [vmem:[#allocation2 + $0x44] ss:$16 sps:$4 sm:$0xff]   ;;  %v3001_v8 = vld [vmem:[#allocation2 + $0x8] ss:$16 sps:$4 sm:$0xff]   ;;  %276 = vmatprep.subr.bf16.mxu1 %v2999_v7 }
  0x6f   :  { %236 = vmatpush1.bf16.msra.mxu0 %v2989_v2  ;;  %v2995_v6 = vld [vmem:[#allocation2 + $0x40] ss:$16 sps:$4 sm:$0xff]   ;;  %v3002_v9 = vld [vmem:[#allocation2 + $0x2c] ss:$16 sps:$4 sm:$0xff]   ;;  %v2996_v10 = vld [vmem:[#allocation2 + $0x64] ss:$16 sps:$4 sm:$0xff]   ;;  %277 = vmatpush1.bf16.msra.mxu1 %v3001_v8 }
  0x70   :  { %237 = vmatprep.subr.bf16.mxu0 %v2990_v3  ;;  %v3004_v11 = vld [vmem:[#allocation2 + $0x28] ss:$16 sps:$4 sm:$0xff]   ;;  %v2998_v12 = vld [vmem:[#allocation2 + $0x60] ss:$16 sps:$4 sm:$0xff]   ;;  %278 = vmatprep.subr.bf16.mxu1 %v3002_v9  ;;  %v3005_v13 = vld [vmem:[#allocation2 + $0x4c] ss:$16 sps:$4 sm:$0xff]  }
  0x71   :  { %v111_v14 = vld [vmem:[%s3767_s0] sm:$0x3]  ;;  %v3013_v15 = vld [vmem:[#allocation6 + $0x4] ss:$16 sps:$4 sm:$0xff]   ;;  %v3008_v18 = vld [vmem:[#allocation2 + $0x6c] ss:$16 sps:$4 sm:$0xff]  }
  0x72   :  { %v3007_v16 = vld [vmem:[#allocation2 + $0x48] ss:$16 sps:$4 sm:$0xff]   ;;  %v112_v17 = vpack.c.bf16 %v111_v14, %v111_v14  ;;  %v3011_v19 = vld [vmem:[#allocation6] ss:$16 sps:$4 sm:$0xff]   ;;  %v3016_v22 = vld [vmem:[#allocation6 + $0xc] ss:$16 sps:$4 sm:$0xff]  }
  0x73   :  { %238 = vmatpush1.bf16.msra.mxu0 %v2992_v4  ;;  %279 = vmatpush1.bf16.msra.mxu1 %v3004_v11  ;;  %v3019_v20 = vld [vmem:[#allocation6 + $0x24] ss:$16 sps:$4 sm:$0xff]   ;;  %v3017_v23 = vld [vmem:[#allocation6 + $0x20] ss:$16 sps:$4 sm:$0xff]   ;;  %v3014_v25 = vld [vmem:[#allocation6 + $0x8] ss:$16 sps:$4 sm:$0xff]  }
  0x74   :  { %239 = vmatprep.subr.bf16.mxu0 %v2993_v5  ;;  %280 = vmatprep.subr.bf16.mxu1 %v3005_v13  ;;  %v3010_v21 = vld [vmem:[#allocation2 + $0x68] ss:$16 sps:$4 sm:$0xff]   ;;  %v3022_v26 = vld [vmem:[#allocation6 + $0x2c] ss:$16 sps:$4 sm:$0xff]   ;;  %v3023_v27 = vld [vmem:[#allocation6 + $0x40] ss:$16 sps:$4 sm:$0xff]  }
  0x75   :  { %v3025_v24 = vld [vmem:[#allocation6 + $0x44] ss:$16 sps:$4 sm:$0xff]   ;;  %v3020_v29 = vld [vmem:[#allocation6 + $0x28] ss:$16 sps:$4 sm:$0xff]   ;;  %v3028_v30 = vld [vmem:[#allocation6 + $0x4c] ss:$16 sps:$4 sm:$0xff]  }
  0x76   :  { %v3031_v28 = vld [vmem:[#allocation6 + $0x64] ss:$16 sps:$4 sm:$0xff]   ;;  %v3029_v31 = vld [vmem:[#allocation6 + $0x60] ss:$16 sps:$4 sm:$0xff]   ;;  %v3026_v33 = vld [vmem:[#allocation6 + $0x48] ss:$16 sps:$4 sm:$0xff]  }
  0x77   :  { %240 = vmatpush1.bf16.msra.mxu0 %v2995_v6  ;;  %281 = vmatpush1.bf16.msra.mxu1 %v3007_v16  ;;  %v3037_v32 = vld [vmem:[#allocation6 + $0x84] ss:$16 sps:$4 sm:$0xff]   ;;  %v3034_v34 = vld [vmem:[#allocation6 + $0x6c] ss:$16 sps:$4 sm:$0xff]   ;;  %v3035_v35 = vld [vmem:[#allocation6 + $0x80] ss:$16 sps:$4 sm:$0xff]  }
  0x78   :  { %241 = vmatprep.subr.bf16.mxu0 %v2996_v10  ;;  %282 = vmatprep.subr.bf16.mxu1 %v3008_v18  ;;  %v3043_v36 = vld [vmem:[#allocation6 + $0xa4] ss:$16 sps:$4 sm:$0xff]   ;;  %v3032_v37 = vld [vmem:[#allocation6 + $0x68] ss:$16 sps:$4 sm:$0xff]   ;;  %v3040_v38 = vld [vmem:[#allocation6 + $0x8c] ss:$16 sps:$4 sm:$0xff]  }
  0x79   :  { %v3041_v39 = vld [vmem:[#allocation6 + $0xa0] ss:$16 sps:$4 sm:$0xff]   ;;  %v3049_v40 = vld [vmem:[#allocation6 + $0xc4] ss:$16 sps:$4 sm:$0xff]   ;;  %v3038_v41 = vld [vmem:[#allocation6 + $0x88] ss:$16 sps:$4 sm:$0xff]  }
  0x7a   :  { %v3046_v42 = vld [vmem:[#allocation6 + $0xac] ss:$16 sps:$4 sm:$0xff]   ;;  %v3047_v43 = vld [vmem:[#allocation6 + $0xc0] ss:$16 sps:$4 sm:$0xff]   ;;  %v3055_v44 = vld [vmem:[#allocation6 + $0xe4] ss:$16 sps:$4 sm:$0xff]  }
  0x7b   :  { %242 = vmatpush1.bf16.msra.mxu0 %v2998_v12  ;;  %283 = vmatpush1.bf16.msra.mxu1 %v3010_v21  ;;  %v3044_v45 = vld [vmem:[#allocation6 + $0xa8] ss:$16 sps:$4 sm:$0xff]   ;;  %v3052_v46 = vld [vmem:[#allocation6 + $0xcc] ss:$16 sps:$4 sm:$0xff]   ;;  %v3053_v47 = vld [vmem:[#allocation6 + $0xe0] ss:$16 sps:$4 sm:$0xff]   ;;  %v131_v21 = vlaneseq }
  0x7c   :  { %1115 = vmatprep.subr.bf16.mxu0 %v3013_v15  ;;  %1197 = vmatprep.subr.bf16.mxu1 %v3016_v22  ;;  %v3061_v48 = vld [vmem:[#allocation6 + $0x104] ss:$16 sps:$4 sm:$0xff]   ;;  %v3050_v49 = vld [vmem:[#allocation6 + $0xc8] ss:$16 sps:$4 sm:$0xff]   ;;  %v3058_v50 = vld [vmem:[#allocation6 + $0xec] ss:$16 sps:$4 sm:$0xff]  }
  0x7d   :  { %v3056_v51 = vld [vmem:[#allocation6 + $0xe8] ss:$16 sps:$4 sm:$0xff]   ;;  %v3059_v52 = vld [vmem:[#allocation6 + $0x100] ss:$16 sps:$4 sm:$0xff]   ;;  %v3064_v53 = vld [vmem:[#allocation6 + $0x10c] ss:$16 sps:$4 sm:$0xff]  }
  0x7e   :  { %2617 = vmatmul.mubr.msk.bf16.vlgmr.msra.gmra.mrb[0].mxu0 %vm231_vm0, %v112_v17  ;;  %2618 = vmatmul.mubr.msk.bf16.vlgmr.msra.gmra.mrb[0].mxu1 %vm231_vm0, %v112_v17  ;;  %v3067_v54 = vld [vmem:[#allocation6 + $0x124] ss:$16 sps:$4 sm:$0xff]   ;;  %v3065_v55 = vld [vmem:[#allocation6 + $0x120] ss:$16 sps:$4 sm:$0xff]   ;;  %v3062_v57 = vld [vmem:[#allocation6 + $0x108] ss:$16 sps:$4 sm:$0xff]  }
  0x7f   :  { %1116 = vmatpush1.bf16.msra.mxu0 %v3011_v19  ;;  %1198 = vmatpush1.bf16.msra.mxu1 %v3014_v25  ;;  %v3073_v56 = vld [vmem:[#allocation6 + $0x144] ss:$16 sps:$4 sm:$0xff]   ;;  %v3070_v58 = vld [vmem:[#allocation6 + $0x12c] ss:$16 sps:$4 sm:$0xff]   ;;  %v3071_v59 = vld [vmem:[#allocation6 + $0x140] ss:$16 sps:$4 sm:$0xff]  }
  0x80   :  { %1117 = vmatprep.subr.bf16.mxu0 %v3019_v20  ;;  %1199 = vmatprep.subr.bf16.mxu1 %v3022_v26  ;;  %v3079_v60 = vld [vmem:[#allocation6 + $0x164] ss:$16 sps:$4 sm:$0xff]   ;;  %v3068_v61 = vld [vmem:[#allocation6 + $0x128] ss:$16 sps:$4 sm:$0xff]   ;;  %v3076_v62 = vld [vmem:[#allocation6 + $0x14c] ss:$16 sps:$4 sm:$0xff]  }
  0x81   :  { %v3077_v63 = vld [vmem:[#allocation6 + $0x160] ss:$16 sps:$4 sm:$0xff]   ;;  %v3085_v0 = vld [vmem:[#allocation6 + $0x184] ss:$16 sps:$4 sm:$0xff]   ;;  %v3074_v1 = vld [vmem:[#allocation6 + $0x148] ss:$16 sps:$4 sm:$0xff]  }
  0x82   :  { %v3082_v2 = vld [vmem:[#allocation6 + $0x16c] ss:$16 sps:$4 sm:$0xff]   ;;  %v3083_v3 = vld [vmem:[#allocation6 + $0x180] ss:$16 sps:$4 sm:$0xff]   ;;  %v3091_v4 = vld [vmem:[#allocation6 + $0x1a4] ss:$16 sps:$4 sm:$0xff]  }
  0x83   :  { %1118 = vmatpush1.bf16.msra.mxu0 %v3017_v23  ;;  %1200 = vmatpush1.bf16.msra.mxu1 %v3020_v29  ;;  %v3080_v5 = vld [vmem:[#allocation6 + $0x168] ss:$16 sps:$4 sm:$0xff]   ;;  %v3088_v6 = vld [vmem:[#allocation6 + $0x18c] ss:$16 sps:$4 sm:$0xff]   ;;  %v3089_v7 = vld [vmem:[#allocation6 + $0x1a0] ss:$16 sps:$4 sm:$0xff]  }
  0x84   :  { %1119 = vmatprep.subr.bf16.mxu0 %v3025_v24  ;;  %1201 = vmatprep.subr.bf16.mxu1 %v3028_v30  ;;  %v3086_v8 = vld [vmem:[#allocation6 + $0x188] ss:$16 sps:$4 sm:$0xff]   ;;  %v3094_v9 = vld [vmem:[#allocation6 + $0x1ac] ss:$16 sps:$4 sm:$0xff]   ;;  %v3097_v11 = vld [vmem:[#allocation6 + $0x1c4] ss:$16 sps:$4 sm:$0xff]  }
  0x85   :  { %v3092_v10 = vld [vmem:[#allocation6 + $0x1a8] ss:$16 sps:$4 sm:$0xff]   ;;  %v3100_v12 = vld [vmem:[#allocation6 + $0x1cc] ss:$16 sps:$4 sm:$0xff]   ;;  %v3095_v13 = vld [vmem:[#allocation6 + $0x1c0] ss:$16 sps:$4 sm:$0xff]  }
  0x86   :  { %v3098_v14 = vld [vmem:[#allocation6 + $0x1c8] ss:$16 sps:$4 sm:$0xff]   ;;  %v3103_v15 = vld [vmem:[#allocation6 + $0x1e4] ss:$16 sps:$4 sm:$0xff]   ;;  %v3106_v16 = vld [vmem:[#allocation6 + $0x1ec] ss:$16 sps:$4 sm:$0xff]  }
  0x87   :  { %1120 = vmatpush1.bf16.msra.mxu0 %v3023_v27  ;;  %1202 = vmatpush1.bf16.msra.mxu1 %v3026_v33  ;;  %v3101_v17 = vld [vmem:[#allocation6 + $0x1e0] ss:$16 sps:$4 sm:$0xff]   ;;  %v3104_v18 = vld [vmem:[#allocation6 + $0x1e8] ss:$16 sps:$4 sm:$0xff]   ;;  %v3109_v19 = vld [vmem:[#allocation6 + $0x204] ss:$16 sps:$4 sm:$0xff]  }
  0x88   :  { %1121 = vmatprep.subr.bf16.mxu0 %v3031_v28  ;;  %1203 = vmatprep.subr.bf16.mxu1 %v3034_v34  ;;  %v3112_v20 = vld [vmem:[#allocation6 + $0x20c] ss:$16 sps:$4 sm:$0xff]   ;;  %v3714_v22 = vshrl.u32 %v131_v21, 7  ;;  %v3169_v21 = vld [vmem:[#allocation6 + $0x344] ss:$16 sps:$4 sm:$0xff]  }
  0x89   :  { %v3719_v24 = vld [vmem:[#allocation4] sm:$0xf] }
  0x8a   :  { %v3717_v23 = vsub.s32 0, %v3714_v22  ;;  %v3722_v25 = vsub.s32 1, %v3714_v22  ;;  %v3729_v29 = vsub.s32 3, %v3714_v22 }
  0x8b   :  { %1122 = vmatpush1.bf16.msra.mxu0 %v3029_v31  ;;  %1204 = vmatpush1.bf16.msra.mxu1 %v3032_v37 }
  0x8c   :  { %1123 = vmatprep.subr.bf16.mxu0 %v3037_v32  ;;  %1205 = vmatprep.subr.bf16.mxu1 %v3040_v38  ;;  %v134_v26 = vrot.slane %v3719_v24, %v3717_v23  ;;  %v138_v27 = vrot.slane %v3719_v24, %v3722_v25  ;;  %v146_v37 = vrot.slane %v3719_v24, %v3729_v29 }
  0x8f   :  { %1124 = vmatpush1.bf16.msra.mxu0 %v3035_v35  ;;  %1206 = vmatpush1.bf16.msra.mxu1 %v3038_v41 }
  0x90   :  { %1125 = vmatprep.subr.bf16.mxu0 %v3043_v36  ;;  %1207 = vmatprep.subr.bf16.mxu1 %v3046_v42 }
  0x93   :  { %1126 = vmatpush1.bf16.msra.mxu0 %v3041_v39  ;;  %1208 = vmatpush1.bf16.msra.mxu1 %v3044_v45  ;;  %v3107_v39 = vld [vmem:[#allocation6 + $0x200] ss:$16 sps:$4 sm:$0xff]  }
  0x94   :  { %1127 = vmatprep.subr.bf16.mxu0 %v3049_v40  ;;  %1209 = vmatprep.subr.bf16.mxu1 %v3052_v46  ;;  %v3110_v40 = vld [vmem:[#allocation6 + $0x208] ss:$16 sps:$4 sm:$0xff]  }
  0x97   :  { %1128 = vmatpush1.bf16.msra.mxu0 %v3047_v43  ;;  %1210 = vmatpush1.bf16.msra.mxu1 %v3050_v49  ;;  %v3115_v43 = vld [vmem:[#allocation6 + $0x224] ss:$16 sps:$4 sm:$0xff]   ;;  %v3113_v49 = vld [vmem:[#allocation6 + $0x220] ss:$16 sps:$4 sm:$0xff]  }
  0x98   :  { %1129 = vmatprep.subr.bf16.mxu0 %v3055_v44  ;;  %1211 = vmatprep.subr.bf16.mxu1 %v3058_v50  ;;  %v3118_v44 = vld [vmem:[#allocation6 + $0x22c] ss:$16 sps:$4 sm:$0xff]   ;;  %v3116_v50 = vld [vmem:[#allocation6 + $0x228] ss:$16 sps:$4 sm:$0xff]  }
  0x9b   :  { %1130 = vmatpush1.bf16.msra.mxu0 %v3053_v47  ;;  %1212 = vmatpush1.bf16.msra.mxu1 %v3056_v51 }
  0x9c   :  { %1131 = vmatprep.subr.bf16.mxu0 %v3061_v48  ;;  %1213 = vmatprep.subr.bf16.mxu1 %v3064_v53  ;;  %v3124_v53 = vld [vmem:[#allocation6 + $0x24c] ss:$16 sps:$4 sm:$0xff]  }
  0x9f   :  { %1132 = vmatpush1.bf16.msra.mxu0 %v3059_v52  ;;  %1214 = vmatpush1.bf16.msra.mxu1 %v3062_v57  ;;  %v3121_v52 = vld [vmem:[#allocation6 + $0x244] ss:$16 sps:$4 sm:$0xff]  }
  0xa0   :  { %1133 = vmatprep.subr.bf16.mxu0 %v3067_v54  ;;  %1215 = vmatprep.subr.bf16.mxu1 %v3070_v58  ;;  %v3127_v57 = vld [vmem:[#allocation6 + $0x264] ss:$16 sps:$4 sm:$0xff]   ;;  %v3130_v58 = vld [vmem:[#allocation6 + $0x26c] ss:$16 sps:$4 sm:$0xff]  }
  0xa3   :  { %1134 = vmatpush1.bf16.msra.mxu0 %v3065_v55  ;;  %1216 = vmatpush1.bf16.msra.mxu1 %v3068_v61  ;;  %v3119_v55 = vld [vmem:[#allocation6 + $0x240] ss:$16 sps:$4 sm:$0xff]   ;;  %v3133_v61 = vld [vmem:[#allocation6 + $0x284] ss:$16 sps:$4 sm:$0xff]  }
  0xa4   :  { %1135 = vmatprep.subr.bf16.mxu0 %v3073_v56  ;;  %1217 = vmatprep.subr.bf16.mxu1 %v3076_v62  ;;  %v3122_v56 = vld [vmem:[#allocation6 + $0x248] ss:$16 sps:$4 sm:$0xff]   ;;  %v3136_v62 = vld [vmem:[#allocation6 + $0x28c] ss:$16 sps:$4 sm:$0xff]  }
  0xa7   :  { %1136 = vmatpush1.bf16.msra.mxu0 %v3071_v59  ;;  %1218 = vmatpush1.bf16.msra.mxu1 %v3074_v1  ;;  %v3125_v59 = vld [vmem:[#allocation6 + $0x260] ss:$16 sps:$4 sm:$0xff]   ;;  %v3139_v1 = vld [vmem:[#allocation6 + $0x2a4] ss:$16 sps:$4 sm:$0xff]  }
  0xa8   :  { %1137 = vmatprep.subr.bf16.mxu0 %v3079_v60  ;;  %1219 = vmatprep.subr.bf16.mxu1 %v3082_v2  ;;  %v3128_v60 = vld [vmem:[#allocation6 + $0x268] ss:$16 sps:$4 sm:$0xff]   ;;  %v3142_v2 = vld [vmem:[#allocation6 + $0x2ac] ss:$16 sps:$4 sm:$0xff]  }
  0xab   :  { %1138 = vmatpush1.bf16.msra.mxu0 %v3077_v63  ;;  %1220 = vmatpush1.bf16.msra.mxu1 %v3080_v5  ;;  %v3131_v63 = vld [vmem:[#allocation6 + $0x280] ss:$16 sps:$4 sm:$0xff]   ;;  %v3145_v5 = vld [vmem:[#allocation6 + $0x2c4] ss:$16 sps:$4 sm:$0xff]  }
  0xac   :  { %1139 = vmatprep.subr.bf16.mxu0 %v3085_v0  ;;  %1221 = vmatprep.subr.bf16.mxu1 %v3088_v6  ;;  %v3134_v0 = vld [vmem:[#allocation6 + $0x288] ss:$16 sps:$4 sm:$0xff]   ;;  %v3148_v6 = vld [vmem:[#allocation6 + $0x2cc] ss:$16 sps:$4 sm:$0xff]  }
  0xaf   :  { %1140 = vmatpush1.bf16.msra.mxu0 %v3083_v3  ;;  %1222 = vmatpush1.bf16.msra.mxu1 %v3086_v8  ;;  %v3137_v3 = vld [vmem:[#allocation6 + $0x2a0] ss:$16 sps:$4 sm:$0xff]   ;;  %v3146_v8 = vld [vmem:[#allocation6 + $0x2c8] ss:$16 sps:$4 sm:$0xff]  }
  0xb0   :  { %1141 = vmatprep.subr.bf16.mxu0 %v3091_v4  ;;  %1223 = vmatprep.subr.bf16.mxu1 %v3094_v9  ;;  %v3140_v4 = vld [vmem:[#allocation6 + $0x2a8] ss:$16 sps:$4 sm:$0xff]   ;;  %v3151_v9 = vld [vmem:[#allocation6 + $0x2e4] ss:$16 sps:$4 sm:$0xff]  }
  0xb3   :  { %1142 = vmatpush1.bf16.msra.mxu0 %v3089_v7  ;;  %1224 = vmatpush1.bf16.msra.mxu1 %v3092_v10  ;;  %v3143_v7 = vld [vmem:[#allocation6 + $0x2c0] ss:$16 sps:$4 sm:$0xff]   ;;  %v3154_v10 = vld [vmem:[#allocation6 + $0x2ec] ss:$16 sps:$4 sm:$0xff]  }
  0xb4   :  { %1143 = vmatprep.subr.bf16.mxu0 %v3097_v11  ;;  %1225 = vmatprep.subr.bf16.mxu1 %v3100_v12  ;;  %v3149_v11 = vld [vmem:[#allocation6 + $0x2e0] ss:$16 sps:$4 sm:$0xff]   ;;  %v3152_v12 = vld [vmem:[#allocation6 + $0x2e8] ss:$16 sps:$4 sm:$0xff]  }
  0xb7   :  { %1144 = vmatpush1.bf16.msra.mxu0 %v3095_v13  ;;  %1226 = vmatpush1.bf16.msra.mxu1 %v3098_v14  ;;  %v3157_v13 = vld [vmem:[#allocation6 + $0x304] ss:$16 sps:$4 sm:$0xff]   ;;  %v3160_v14 = vld [vmem:[#allocation6 + $0x30c] ss:$16 sps:$4 sm:$0xff]  }
  0xb8   :  { %1145 = vmatprep.subr.bf16.mxu0 %v3103_v15  ;;  %1227 = vmatprep.subr.bf16.mxu1 %v3106_v16  ;;  %v3155_v15 = vld [vmem:[#allocation6 + $0x300] ss:$16 sps:$4 sm:$0xff]   ;;  %v3158_v16 = vld [vmem:[#allocation6 + $0x308] ss:$16 sps:$4 sm:$0xff]  }
  0xbb   :  { %1146 = vmatpush1.bf16.msra.mxu0 %v3101_v17  ;;  %1228 = vmatpush1.bf16.msra.mxu1 %v3104_v18  ;;  %v3163_v17 = vld [vmem:[#allocation6 + $0x324] ss:$16 sps:$4 sm:$0xff]   ;;  %v3166_v18 = vld [vmem:[#allocation6 + $0x32c] ss:$16 sps:$4 sm:$0xff]  }
  0xbc   :  { %1156 = vmatprep.subr.bf16.mxu0 %v3109_v19  ;;  %1238 = vmatprep.subr.bf16.mxu1 %v3112_v20  ;;  %v3161_v19 = vld [vmem:[#allocation6 + $0x320] ss:$16 sps:$4 sm:$0xff]   ;;  %v3164_v20 = vld [vmem:[#allocation6 + $0x328] ss:$16 sps:$4 sm:$0xff]  }
 0x151   :  { %v269_v28 = vpop.f32.mrb[0].mxu0  ;;  %v3733_v41 = vpop.f32.mrb[0].mxu1 }
 0x152   :  { %v270_v30 = vadd.f32 %v269_v28, %v134_v26  ;;  %v271_v31 = vpop.f32.mrb[1].mxu0  ;;  %v312_v45 = vpop.f32.mrb[1].mxu1  ;;  %v3172_v26 = vld [vmem:[#allocation6 + $0x34c] ss:$16 sps:$4 sm:$0xff]   ;;  %v3170_v28 = vld [vmem:[#allocation6 + $0x348] ss:$16 sps:$4 sm:$0xff]  }
 0x153   :  { %v272_v32 = vadd.f32 %v271_v31, %v138_v27  ;;  %v273_v33 = vpop.f32.mrb[2].mxu0  ;;  %v313_v46 = vadd.f32 %v312_v45, %v146_v37  ;;  %v314_v47 = vpop.f32.mrb[2].mxu1  ;;  %v3167_v27 = vld [vmem:[#allocation6 + $0x340] ss:$16 sps:$4 sm:$0xff]   ;;  %v3178_v31 = vld [vmem:[#allocation6 + $0x36c] ss:$16 sps:$4 sm:$0xff]  }
 0x154   :  { %v317_v34 = vmax.f32 %v270_v30, 0.0  ;;  %v274_v35 = vpop.f32.mrb[3].mxu0  ;;  %v315_v48 = vpop.f32.mrb[3].mxu1  ;;  %v3175_v30 = vld [vmem:[#allocation6 + $0x364] ss:$16 sps:$4 sm:$0xff]  }
 0x155   :  { %v318_v36 = vmax.f32 %v272_v32, 0.0  ;;  %v320_v51 = vmax.f32 %v313_v46, 0.0  ;;  %v3173_v32 = vld [vmem:[#allocation6 + $0x360] ss:$16 sps:$4 sm:$0xff]   ;;  %v3176_v33 = vld [vmem:[#allocation6 + $0x368] ss:$16 sps:$4 sm:$0xff]  }
 0x156   :  { %v321_v42 = vpack.c.bf16 %v317_v34, %v317_v34  ;;  %v3181_v34 = vld [vmem:[#allocation6 + $0x384] ss:$16 sps:$4 sm:$0xff]   ;;  %v3184_v35 = vld [vmem:[#allocation6 + $0x38c] ss:$16 sps:$4 sm:$0xff]   ;;  %v3182_v37 = vld [vmem:[#allocation6 + $0x388] ss:$16 sps:$4 sm:$0xff]  }
 0x157   :  { %v322_v38 = vpack.c.bf16 %v318_v36, %v318_v36  ;;  %v324_v54 = vpack.c.bf16 %v320_v51, %v320_v51  ;;  %v3179_v36 = vld [vmem:[#allocation6 + $0x380] ss:$16 sps:$4 sm:$0xff]   ;;  %v3193_v45 = vld [vmem:[#allocation6 + $0x3c4] ss:$16 sps:$4 sm:$0xff]   ;;  %v3196_v46 = vld [vmem:[#allocation6 + $0x3cc] ss:$16 sps:$4 sm:$0xff]  }
 0x158   :  { %v3191_v47 = vld [vmem:[#allocation6 + $0x3c0] ss:$16 sps:$4 sm:$0xff]   ;;  %v3194_v48 = vld [vmem:[#allocation6 + $0x3c8] ss:$16 sps:$4 sm:$0xff]  }
 0x159   :  { %1147 = vmatprep.mubr.bf16.mxu0 %v322_v38  ;;  %1229 = vmatprep.mubr.bf16.mxu1 %v322_v38  ;;  %v3736_v38 = vsub.s32 2, %v3714_v22  ;;  %v3197_v51 = vld [vmem:[#allocation6 + $0x3e0] ss:$16 sps:$4 sm:$0xff]  }
 0x15a   :  { %1148 = vmatmul.mubr.bf16.vlgmr.msra.gmra.mrb[4].mxu0 %v321_v42  ;;  %1230 = vmatmul.mubr.bf16.vlgmr.msra.gmra.mrb[4].mxu1 %v321_v42  ;;  %v3185_v42 = vld [vmem:[#allocation6 + $0x3a0] ss:$16 sps:$4 sm:$0xff]  }
 0x15b   :  { %1157 = vmatpush1.bf16.msra.mxu0 %v3107_v39  ;;  %1239 = vmatpush1.bf16.msra.mxu1 %v3110_v40  ;;  %v3187_v39 = vld [vmem:[#allocation6 + $0x3a4] ss:$16 sps:$4 sm:$0xff]   ;;  %v3190_v40 = vld [vmem:[#allocation6 + $0x3ac] ss:$16 sps:$4 sm:$0xff]  }
 0x15c   :  { %1158 = vmatprep.subr.bf16.mxu0 %v3115_v43  ;;  %1240 = vmatprep.subr.bf16.mxu1 %v3118_v44  ;;  %v3188_v43 = vld [vmem:[#allocation6 + $0x3a8] ss:$16 sps:$4 sm:$0xff]   ;;  %v142_v44 = vrot.slane %v3719_v24, %v3736_v38 }
 0x15d   :  { %1188 = vmatprep.mubr.bf16.mxu0 %v324_v54  ;;  %1270 = vmatprep.mubr.bf16.mxu1 %v324_v54  ;;  %v3205_v24 = vld [vmem:[#allocation9 + $0x4] ss:$16 sps:$4 sm:$0xff]   ;;  %v3208_v54 = vld [vmem:[#allocation9 + $0xc] ss:$16 sps:$4 sm:$0xff]  }
 0x15e   :  { %v311_v22 = vadd.f32 %v3733_v41, %v142_v44  ;;  %v3211_v41 = vld [vmem:[#allocation9 + $0x24] ss:$16 sps:$4 sm:$0xff]  }
 0x15f   :  { %1159 = vmatpush1.bf16.msra.mxu0 %v3113_v49  ;;  %1241 = vmatpush1.bf16.msra.mxu1 %v3116_v50  ;;  %v3199_v49 = vld [vmem:[#allocation6 + $0x3e4] ss:$16 sps:$4 sm:$0xff]   ;;  %v3202_v50 = vld [vmem:[#allocation6 + $0x3ec] ss:$16 sps:$4 sm:$0xff]   ;;  %v3277_v44 = vld [vmem:[#allocation9 + $0x184] ss:$16 sps:$4 sm:$0xff]  }
 0x160   :  { %1160 = vmatprep.subr.bf16.mxu0 %v3121_v52  ;;  %1242 = vmatprep.subr.bf16.mxu1 %v3124_v53  ;;  %v3200_v52 = vld [vmem:[#allocation6 + $0x3e8] ss:$16 sps:$4 sm:$0xff]   ;;  %v319_v53 = vmax.f32 %v311_v22, 0.0  ;;  %v3286_v22 = vld [vmem:[#allocation9 + $0x1ac] ss:$16 sps:$4 sm:$0xff]  }
 0x163   :  { %1161 = vmatpush1.bf16.msra.mxu0 %v3119_v55  ;;  %1243 = vmatpush1.bf16.msra.mxu1 %v3122_v56  ;;  %v3203_v55 = vld [vmem:[#allocation9] ss:$16 sps:$4 sm:$0xff]   ;;  %v3206_v56 = vld [vmem:[#allocation9 + $0x8] ss:$16 sps:$4 sm:$0xff]  }
 0x164   :  { %1162 = vmatprep.subr.bf16.mxu0 %v3127_v57  ;;  %1244 = vmatprep.subr.bf16.mxu1 %v3130_v58  ;;  %v323_v57 = vpack.c.bf16 %v319_v53, %v319_v53  ;;  %v3214_v58 = vld [vmem:[#allocation9 + $0x2c] ss:$16 sps:$4 sm:$0xff]   ;;  %v3287_v53 = vld [vmem:[#allocation9 + $0x1c0] ss:$16 sps:$4 sm:$0xff]  }
 0x167   :  { %1163 = vmatpush1.bf16.msra.mxu0 %v3125_v59  ;;  %1245 = vmatpush1.bf16.msra.mxu1 %v3128_v60  ;;  %v3209_v59 = vld [vmem:[#allocation9 + $0x20] ss:$16 sps:$4 sm:$0xff]   ;;  %v3212_v60 = vld [vmem:[#allocation9 + $0x28] ss:$16 sps:$4 sm:$0xff]  }
 0x168   :  { %1164 = vmatprep.subr.bf16.mxu0 %v3133_v61  ;;  %1246 = vmatprep.subr.bf16.mxu1 %v3136_v62  ;;  %v3217_v61 = vld [vmem:[#allocation9 + $0x44] ss:$16 sps:$4 sm:$0xff]   ;;  %v3220_v62 = vld [vmem:[#allocation9 + $0x4c] ss:$16 sps:$4 sm:$0xff]  }
 0x16b   :  { %1165 = vmatpush1.bf16.msra.mxu0 %v3131_v63  ;;  %1247 = vmatpush1.bf16.msra.mxu1 %v3134_v0  ;;  %v3215_v63 = vld [vmem:[#allocation9 + $0x40] ss:$16 sps:$4 sm:$0xff]   ;;  %v3218_v0 = vld [vmem:[#allocation9 + $0x48] ss:$16 sps:$4 sm:$0xff]  }
 0x16c   :  { %1166 = vmatprep.subr.bf16.mxu0 %v3139_v1  ;;  %1248 = vmatprep.subr.bf16.mxu1 %v3142_v2  ;;  %v3223_v1 = vld [vmem:[#allocation9 + $0x64] ss:$16 sps:$4 sm:$0xff]   ;;  %v3226_v2 = vld [vmem:[#allocation9 + $0x6c] ss:$16 sps:$4 sm:$0xff]  }
 0x16f   :  { %1167 = vmatpush1.bf16.msra.mxu0 %v3137_v3  ;;  %1249 = vmatpush1.bf16.msra.mxu1 %v3140_v4  ;;  %v3221_v3 = vld [vmem:[#allocation9 + $0x60] ss:$16 sps:$4 sm:$0xff]   ;;  %v3224_v4 = vld [vmem:[#allocation9 + $0x68] ss:$16 sps:$4 sm:$0xff]  }
 0x170   :  { %1168 = vmatprep.subr.bf16.mxu0 %v3145_v5  ;;  %1250 = vmatprep.subr.bf16.mxu1 %v3148_v6  ;;  %v3229_v5 = vld [vmem:[#allocation9 + $0x84] ss:$16 sps:$4 sm:$0xff]   ;;  %v3232_v6 = vld [vmem:[#allocation9 + $0x8c] ss:$16 sps:$4 sm:$0xff]  }
 0x173   :  { %1169 = vmatpush1.bf16.msra.mxu0 %v3143_v7  ;;  %1251 = vmatpush1.bf16.msra.mxu1 %v3146_v8  ;;  %v3227_v7 = vld [vmem:[#allocation9 + $0x80] ss:$16 sps:$4 sm:$0xff]   ;;  %v3230_v8 = vld [vmem:[#allocation9 + $0x88] ss:$16 sps:$4 sm:$0xff]  }
 0x174   :  { %1170 = vmatprep.subr.bf16.mxu0 %v3151_v9  ;;  %1252 = vmatprep.subr.bf16.mxu1 %v3154_v10  ;;  %v3235_v9 = vld [vmem:[#allocation9 + $0xa4] ss:$16 sps:$4 sm:$0xff]   ;;  %v3238_v10 = vld [vmem:[#allocation9 + $0xac] ss:$16 sps:$4 sm:$0xff]  }
 0x177   :  { %1171 = vmatpush1.bf16.msra.mxu0 %v3149_v11  ;;  %1253 = vmatpush1.bf16.msra.mxu1 %v3152_v12  ;;  %v3233_v11 = vld [vmem:[#allocation9 + $0xa0] ss:$16 sps:$4 sm:$0xff]   ;;  %v3236_v12 = vld [vmem:[#allocation9 + $0xa8] ss:$16 sps:$4 sm:$0xff]  }
 0x178   :  { %1172 = vmatprep.subr.bf16.mxu0 %v3157_v13  ;;  %1254 = vmatprep.subr.bf16.mxu1 %v3160_v14  ;;  %v3241_v13 = vld [vmem:[#allocation9 + $0xc4] ss:$16 sps:$4 sm:$0xff]   ;;  %v3244_v14 = vld [vmem:[#allocation9 + $0xcc] ss:$16 sps:$4 sm:$0xff]  }
 0x17b   :  { %1173 = vmatpush1.bf16.msra.mxu0 %v3155_v15  ;;  %1255 = vmatpush1.bf16.msra.mxu1 %v3158_v16  ;;  %v3239_v15 = vld [vmem:[#allocation9 + $0xc0] ss:$16 sps:$4 sm:$0xff]   ;;  %v3242_v16 = vld [vmem:[#allocation9 + $0xc8] ss:$16 sps:$4 sm:$0xff]  }
 0x17c   :  { %1174 = vmatprep.subr.bf16.mxu0 %v3163_v17  ;;  %1256 = vmatprep.subr.bf16.mxu1 %v3166_v18  ;;  %v3247_v17 = vld [vmem:[#allocation9 + $0xe4] ss:$16 sps:$4 sm:$0xff]   ;;  %v3250_v18 = vld [vmem:[#allocation9 + $0xec] ss:$16 sps:$4 sm:$0xff]  }
 0x17f   :  { %1175 = vmatpush1.bf16.msra.mxu0 %v3161_v19  ;;  %1257 = vmatpush1.bf16.msra.mxu1 %v3164_v20  ;;  %v3245_v19 = vld [vmem:[#allocation9 + $0xe0] ss:$16 sps:$4 sm:$0xff]   ;;  %v3248_v20 = vld [vmem:[#allocation9 + $0xe8] ss:$16 sps:$4 sm:$0xff]  }
 0x180   :  { %1176 = vmatprep.subr.bf16.mxu0 %v3169_v21  ;;  %1258 = vmatprep.subr.bf16.mxu1 %v3172_v26  ;;  %v3253_v21 = vld [vmem:[#allocation9 + $0x104] ss:$16 sps:$4 sm:$0xff]   ;;  %v3256_v26 = vld [vmem:[#allocation9 + $0x10c] ss:$16 sps:$4 sm:$0xff]  }
 0x183   :  { %1177 = vmatpush1.bf16.msra.mxu0 %v3167_v27  ;;  %1259 = vmatpush1.bf16.msra.mxu1 %v3170_v28  ;;  %v3251_v27 = vld [vmem:[#allocation9 + $0x100] ss:$16 sps:$4 sm:$0xff]   ;;  %v3254_v28 = vld [vmem:[#allocation9 + $0x108] ss:$16 sps:$4 sm:$0xff]  }
 0x184   :  { %1178 = vmatprep.subr.bf16.mxu0 %v3175_v30  ;;  %1260 = vmatprep.subr.bf16.mxu1 %v3178_v31  ;;  %v3259_v30 = vld [vmem:[#allocation9 + $0x124] ss:$16 sps:$4 sm:$0xff]   ;;  %v3262_v31 = vld [vmem:[#allocation9 + $0x12c] ss:$16 sps:$4 sm:$0xff]  }
 0x187   :  { %1179 = vmatpush1.bf16.msra.mxu0 %v3173_v32  ;;  %1261 = vmatpush1.bf16.msra.mxu1 %v3176_v33  ;;  %v3257_v32 = vld [vmem:[#allocation9 + $0x120] ss:$16 sps:$4 sm:$0xff]   ;;  %v3260_v33 = vld [vmem:[#allocation9 + $0x128] ss:$16 sps:$4 sm:$0xff]  }
 0x188   :  { %1180 = vmatprep.subr.bf16.mxu0 %v3181_v34  ;;  %1262 = vmatprep.subr.bf16.mxu1 %v3184_v35  ;;  %v3265_v34 = vld [vmem:[#allocation9 + $0x144] ss:$16 sps:$4 sm:$0xff]   ;;  %v3268_v35 = vld [vmem:[#allocation9 + $0x14c] ss:$16 sps:$4 sm:$0xff]  }
 0x18b   :  { %1181 = vmatpush1.bf16.msra.mxu0 %v3179_v36  ;;  %1263 = vmatpush1.bf16.msra.mxu1 %v3182_v37  ;;  %v3263_v36 = vld [vmem:[#allocation9 + $0x140] ss:$16 sps:$4 sm:$0xff]   ;;  %v3266_v37 = vld [vmem:[#allocation9 + $0x148] ss:$16 sps:$4 sm:$0xff]  }
 0x18c   :  { %1182 = vmatprep.subr.bf16.mxu0 %v3187_v39  ;;  %1264 = vmatprep.subr.bf16.mxu1 %v3190_v40  ;;  %v3271_v39 = vld [vmem:[#allocation9 + $0x164] ss:$16 sps:$4 sm:$0xff]   ;;  %v3274_v40 = vld [vmem:[#allocation9 + $0x16c] ss:$16 sps:$4 sm:$0xff]  }
 0x18f   :  { %1183 = vmatpush1.bf16.msra.mxu0 %v3185_v42  ;;  %1265 = vmatpush1.bf16.msra.mxu1 %v3188_v43  ;;  %v3269_v42 = vld [vmem:[#allocation9 + $0x160] ss:$16 sps:$4 sm:$0xff]   ;;  %v3272_v43 = vld [vmem:[#allocation9 + $0x168] ss:$16 sps:$4 sm:$0xff]  }
 0x190   :  { %1184 = vmatprep.subr.bf16.mxu0 %v3193_v45  ;;  %1266 = vmatprep.subr.bf16.mxu1 %v3196_v46  ;;  %v3280_v45 = vld [vmem:[#allocation9 + $0x18c] ss:$16 sps:$4 sm:$0xff]   ;;  %v3275_v46 = vld [vmem:[#allocation9 + $0x180] ss:$16 sps:$4 sm:$0xff]  }
 0x193   :  { %1185 = vmatpush1.bf16.msra.mxu0 %v3191_v47  ;;  %1267 = vmatpush1.bf16.msra.mxu1 %v3194_v48  ;;  %v3278_v47 = vld [vmem:[#allocation9 + $0x188] ss:$16 sps:$4 sm:$0xff]   ;;  %v3283_v48 = vld [vmem:[#allocation9 + $0x1a4] ss:$16 sps:$4 sm:$0xff]  }
 0x194   :  { %1186 = vmatprep.subr.bf16.mxu0 %v3199_v49  ;;  %1268 = vmatprep.subr.bf16.mxu1 %v3202_v50  ;;  %v3281_v49 = vld [vmem:[#allocation9 + $0x1a0] ss:$16 sps:$4 sm:$0xff]   ;;  %v3284_v50 = vld [vmem:[#allocation9 + $0x1a8] ss:$16 sps:$4 sm:$0xff]  }
 0x197   :  { %1187 = vmatpush1.bf16.msra.mxu0 %v3197_v51  ;;  %1269 = vmatpush1.bf16.msra.mxu1 %v3200_v52  ;;  %v3289_v51 = vld [vmem:[#allocation9 + $0x1c4] ss:$16 sps:$4 sm:$0xff]   ;;  %v3292_v52 = vld [vmem:[#allocation9 + $0x1cc] ss:$16 sps:$4 sm:$0xff]  }
 0x198   :  { %2077 = vmatprep.subr.bf16.mxu0 %v3205_v24  ;;  %2159 = vmatprep.subr.bf16.mxu1 %v3208_v54  ;;  %v3290_v24 = vld [vmem:[#allocation9 + $0x1c8] ss:$16 sps:$4 sm:$0xff]   ;;  %v3295_v54 = vld [vmem:[#allocation9 + $0x1e4] ss:$16 sps:$4 sm:$0xff]  }
 0x19a   :  { %1189 = vmatmul.mubr.bf16.vlgmr.msra.gmra.mrb[4].mxu0 %v323_v57  ;;  %1271 = vmatmul.mubr.bf16.vlgmr.msra.gmra.mrb[4].mxu1 %v323_v57  ;;  %v3296_v57 = vld [vmem:[#allocation9 + $0x1e8] ss:$16 sps:$4 sm:$0xff]  }
 0x19b   :  { %2078 = vmatpush1.bf16.msra.mxu0 %v3203_v55  ;;  %2160 = vmatpush1.bf16.msra.mxu1 %v3206_v56  ;;  %v3298_v55 = vld [vmem:[#allocation9 + $0x1ec] ss:$16 sps:$4 sm:$0xff]   ;;  %v3293_v56 = vld [vmem:[#allocation9 + $0x1e0] ss:$16 sps:$4 sm:$0xff]  }
 0x19c   :  { %2079 = vmatprep.subr.bf16.mxu0 %v3211_v41  ;;  %2161 = vmatprep.subr.bf16.mxu1 %v3214_v58  ;;  %v3301_v41 = vld [vmem:[#allocation9 + $0x204] ss:$16 sps:$4 sm:$0xff]   ;;  %v3304_v58 = vld [vmem:[#allocation9 + $0x20c] ss:$16 sps:$4 sm:$0xff]  }
 0x19f   :  { %2080 = vmatpush1.bf16.msra.mxu0 %v3209_v59  ;;  %2162 = vmatpush1.bf16.msra.mxu1 %v3212_v60  ;;  %v3741_v59 = vld [vmem:[#allocation7] sm:$0xf] }
 0x1a0   :  { %2081 = vmatprep.subr.bf16.mxu0 %v3217_v61  ;;  %2163 = vmatprep.subr.bf16.mxu1 %v3220_v62  ;;  %v458_v60 = vrot.slane %v3741_v59, %v3717_v23  ;;  %v462_v61 = vrot.slane %v3741_v59, %v3722_v25  ;;  %v470_v62 = vrot.slane %v3741_v59, %v3729_v29 }
 0x1a3   :  { %2082 = vmatpush1.bf16.msra.mxu0 %v3215_v63  ;;  %2164 = vmatpush1.bf16.msra.mxu1 %v3218_v0 }
 0x1a4   :  { %2083 = vmatprep.subr.bf16.mxu0 %v3223_v1  ;;  %2165 = vmatprep.subr.bf16.mxu1 %v3226_v2 }
 0x1a7   :  { %2084 = vmatpush1.bf16.msra.mxu0 %v3221_v3  ;;  %2166 = vmatpush1.bf16.msra.mxu1 %v3224_v4 }
 0x1a8   :  { %2085 = vmatprep.subr.bf16.mxu0 %v3229_v5  ;;  %2167 = vmatprep.subr.bf16.mxu1 %v3232_v6 }
 0x1ab   :  { %2086 = vmatpush1.bf16.msra.mxu0 %v3227_v7  ;;  %2168 = vmatpush1.bf16.msra.mxu1 %v3230_v8 }
 0x1ac   :  { %2087 = vmatprep.subr.bf16.mxu0 %v3235_v9  ;;  %2169 = vmatprep.subr.bf16.mxu1 %v3238_v10 }
 0x1af   :  { %2088 = vmatpush1.bf16.msra.mxu0 %v3233_v11  ;;  %2170 = vmatpush1.bf16.msra.mxu1 %v3236_v12 }
 0x1b0   :  { %2089 = vmatprep.subr.bf16.mxu0 %v3241_v13  ;;  %2171 = vmatprep.subr.bf16.mxu1 %v3244_v14  ;;  %v3299_v14 = vld [vmem:[#allocation9 + $0x200] ss:$16 sps:$4 sm:$0xff]  }
 0x1b3   :  { %2090 = vmatpush1.bf16.msra.mxu0 %v3239_v15  ;;  %2172 = vmatpush1.bf16.msra.mxu1 %v3242_v16  ;;  %v3302_v15 = vld [vmem:[#allocation9 + $0x208] ss:$16 sps:$4 sm:$0xff]  }
 0x1b4   :  { %2091 = vmatprep.subr.bf16.mxu0 %v3247_v17  ;;  %2173 = vmatprep.subr.bf16.mxu1 %v3250_v18  ;;  %v3307_v17 = vld [vmem:[#allocation9 + $0x224] ss:$16 sps:$4 sm:$0xff]   ;;  %v3310_v18 = vld [vmem:[#allocation9 + $0x22c] ss:$16 sps:$4 sm:$0xff]  }
 0x1b7   :  { %2092 = vmatpush1.bf16.msra.mxu0 %v3245_v19  ;;  %2174 = vmatpush1.bf16.msra.mxu1 %v3248_v20  ;;  %v3305_v20 = vld [vmem:[#allocation9 + $0x220] ss:$16 sps:$4 sm:$0xff]  }
 0x1b8   :  { %2093 = vmatprep.subr.bf16.mxu0 %v3253_v21  ;;  %2175 = vmatprep.subr.bf16.mxu1 %v3256_v26  ;;  %v3308_v21 = vld [vmem:[#allocation9 + $0x228] ss:$16 sps:$4 sm:$0xff]   ;;  %v3313_v26 = vld [vmem:[#allocation9 + $0x244] ss:$16 sps:$4 sm:$0xff]  }
 0x1bb   :  { %2094 = vmatpush1.bf16.msra.mxu0 %v3251_v27  ;;  %2176 = vmatpush1.bf16.msra.mxu1 %v3254_v28  ;;  %v3316_v27 = vld [vmem:[#allocation9 + $0x24c] ss:$16 sps:$4 sm:$0xff]   ;;  %v3311_v28 = vld [vmem:[#allocation9 + $0x240] ss:$16 sps:$4 sm:$0xff]  }
 0x1bc   :  { %2095 = vmatprep.subr.bf16.mxu0 %v3259_v30  ;;  %2177 = vmatprep.subr.bf16.mxu1 %v3262_v31  ;;  %v3314_v30 = vld [vmem:[#allocation9 + $0x248] ss:$16 sps:$4 sm:$0xff]   ;;  %v3319_v31 = vld [vmem:[#allocation9 + $0x264] ss:$16 sps:$4 sm:$0xff]  }
 0x1bf   :  { %2096 = vmatpush1.bf16.msra.mxu0 %v3257_v32  ;;  %2178 = vmatpush1.bf16.msra.mxu1 %v3260_v33  ;;  %v3322_v32 = vld [vmem:[#allocation9 + $0x26c] ss:$16 sps:$4 sm:$0xff]   ;;  %v3317_v33 = vld [vmem:[#allocation9 + $0x260] ss:$16 sps:$4 sm:$0xff]  }
 0x1c0   :  { %2097 = vmatprep.subr.bf16.mxu0 %v3265_v34  ;;  %2179 = vmatprep.subr.bf16.mxu1 %v3268_v35  ;;  %v3320_v34 = vld [vmem:[#allocation9 + $0x268] ss:$16 sps:$4 sm:$0xff]   ;;  %v3325_v35 = vld [vmem:[#allocation9 + $0x284] ss:$16 sps:$4 sm:$0xff]  }
 0x1c3   :  { %2098 = vmatpush1.bf16.msra.mxu0 %v3263_v36  ;;  %2180 = vmatpush1.bf16.msra.mxu1 %v3266_v37  ;;  %v3328_v36 = vld [vmem:[#allocation9 + $0x28c] ss:$16 sps:$4 sm:$0xff]   ;;  %v3323_v37 = vld [vmem:[#allocation9 + $0x280] ss:$16 sps:$4 sm:$0xff]  }
 0x1c4   :  { %2099 = vmatprep.subr.bf16.mxu0 %v3271_v39  ;;  %2181 = vmatprep.subr.bf16.mxu1 %v3274_v40  ;;  %v3326_v39 = vld [vmem:[#allocation9 + $0x288] ss:$16 sps:$4 sm:$0xff]   ;;  %v3331_v40 = vld [vmem:[#allocation9 + $0x2a4] ss:$16 sps:$4 sm:$0xff]  }
 0x1c7   :  { %2100 = vmatpush1.bf16.msra.mxu0 %v3269_v42  ;;  %2182 = vmatpush1.bf16.msra.mxu1 %v3272_v43  ;;  %v3334_v42 = vld [vmem:[#allocation9 + $0x2ac] ss:$16 sps:$4 sm:$0xff]   ;;  %v3329_v43 = vld [vmem:[#allocation9 + $0x2a0] ss:$16 sps:$4 sm:$0xff]  }
 0x1c8   :  { %2101 = vmatprep.subr.bf16.mxu0 %v3277_v44  ;;  %2183 = vmatprep.subr.bf16.mxu1 %v3280_v45  ;;  %v3332_v44 = vld [vmem:[#allocation9 + $0x2a8] ss:$16 sps:$4 sm:$0xff]   ;;  %v3337_v45 = vld [vmem:[#allocation9 + $0x2c4] ss:$16 sps:$4 sm:$0xff]  }
 0x1cb   :  { %2102 = vmatpush1.bf16.msra.mxu0 %v3275_v46  ;;  %2184 = vmatpush1.bf16.msra.mxu1 %v3278_v47  ;;  %v3340_v46 = vld [vmem:[#allocation9 + $0x2cc] ss:$16 sps:$4 sm:$0xff]   ;;  %v3335_v47 = vld [vmem:[#allocation9 + $0x2c0] ss:$16 sps:$4 sm:$0xff]  }
 0x1cc   :  { %2103 = vmatprep.subr.bf16.mxu0 %v3283_v48  ;;  %2185 = vmatprep.subr.bf16.mxu1 %v3286_v22  ;;  %v3338_v48 = vld [vmem:[#allocation9 + $0x2c8] ss:$16 sps:$4 sm:$0xff]   ;;  %v3343_v22 = vld [vmem:[#allocation9 + $0x2e4] ss:$16 sps:$4 sm:$0xff]  }
 0x1cf   :  { %2104 = vmatpush1.bf16.msra.mxu0 %v3281_v49  ;;  %2186 = vmatpush1.bf16.msra.mxu1 %v3284_v50  ;;  %v3346_v49 = vld [vmem:[#allocation9 + $0x2ec] ss:$16 sps:$4 sm:$0xff]   ;;  %v3341_v50 = vld [vmem:[#allocation9 + $0x2e0] ss:$16 sps:$4 sm:$0xff]  }
 0x1d0   :  { %2105 = vmatprep.subr.bf16.mxu0 %v3289_v51  ;;  %2187 = vmatprep.subr.bf16.mxu1 %v3292_v52  ;;  %v3344_v51 = vld [vmem:[#allocation9 + $0x2e8] ss:$16 sps:$4 sm:$0xff]   ;;  %v3349_v52 = vld [vmem:[#allocation9 + $0x304] ss:$16 sps:$4 sm:$0xff]  }
 0x1d3   :  { %2106 = vmatpush1.bf16.msra.mxu0 %v3287_v53  ;;  %2188 = vmatpush1.bf16.msra.mxu1 %v3290_v24  ;;  %v3352_v53 = vld [vmem:[#allocation9 + $0x30c] ss:$16 sps:$4 sm:$0xff]   ;;  %v3347_v24 = vld [vmem:[#allocation9 + $0x300] ss:$16 sps:$4 sm:$0xff]  }
 0x1d4   :  { %2107 = vmatprep.subr.bf16.mxu0 %v3295_v54  ;;  %2189 = vmatprep.subr.bf16.mxu1 %v3298_v55  ;;  %v3350_v54 = vld [vmem:[#allocation9 + $0x308] ss:$16 sps:$4 sm:$0xff]   ;;  %v3355_v55 = vld [vmem:[#allocation9 + $0x324] ss:$16 sps:$4 sm:$0xff]  }
 0x1d7   :  { %2108 = vmatpush1.bf16.msra.mxu0 %v3293_v56  ;;  %2190 = vmatpush1.bf16.msra.mxu1 %v3296_v57  ;;  %v3358_v56 = vld [vmem:[#allocation9 + $0x32c] ss:$16 sps:$4 sm:$0xff]   ;;  %v3353_v57 = vld [vmem:[#allocation9 + $0x320] ss:$16 sps:$4 sm:$0xff]  }
 0x1d8   :  { %2118 = vmatprep.subr.bf16.mxu0 %v3301_v41  ;;  %2200 = vmatprep.subr.bf16.mxu1 %v3304_v58  ;;  %v3356_v41 = vld [vmem:[#allocation9 + $0x328] ss:$16 sps:$4 sm:$0xff]   ;;  %v3361_v58 = vld [vmem:[#allocation9 + $0x344] ss:$16 sps:$4 sm:$0xff]  }
 0x26d   :  { %v1190_v63 = vpop.f32.mrb[4].mxu0  ;;  %v3749_v0 = vpop.f32.mrb[4].mxu1 }
 0x26e   :  { %v2952_v1 = vadd.f32 %v1190_v63, %v458_v60  ;;  %v1192_v2 = vpop.f32.mrb[5].mxu0  ;;  %v1274_v3 = vpop.f32.mrb[5].mxu1  ;;  %v3364_v60 = vld [vmem:[#allocation9 + $0x34c] ss:$16 sps:$4 sm:$0xff]   ;;  %v3367_v63 = vld [vmem:[#allocation9 + $0x364] ss:$16 sps:$4 sm:$0xff]  }
 0x26f   :  { %v2953_v4 = vadd.f32 %v1192_v2, %v462_v61  ;;  %v2955_v5 = vadd.f32 %v1274_v3, %v470_v62  ;;  %v1194_v6 = vpop.f32.mrb[6].mxu0  ;;  %v1276_v7 = vpop.f32.mrb[6].mxu1  ;;  %v3359_v61 = vld [vmem:[#allocation9 + $0x340] ss:$16 sps:$4 sm:$0xff]   ;;  %v3362_v62 = vld [vmem:[#allocation9 + $0x348] ss:$16 sps:$4 sm:$0xff]  }
 0x270   :  { %v1279_v8 = vmax.f32 %v2952_v1, 0.0  ;;  %v1195_v9 = vpop.f32.mrb[7].mxu0  ;;  %v1277_v10 = vpop.f32.mrb[7].mxu1  ;;  %v3370_v1 = vld [vmem:[#allocation9 + $0x36c] ss:$16 sps:$4 sm:$0xff]  }
 0x271   :  { %v1280_v11 = vmax.f32 %v2953_v4, 0.0  ;;  %v1282_v12 = vmax.f32 %v2955_v5, 0.0  ;;  %v3365_v2 = vld [vmem:[#allocation9 + $0x360] ss:$16 sps:$4 sm:$0xff]   ;;  %v3368_v3 = vld [vmem:[#allocation9 + $0x368] ss:$16 sps:$4 sm:$0xff]  }
 0x272   :  { %v1283_v16 = vpack.c.bf16 %v1279_v8, %v1279_v8  ;;  %v3373_v4 = vld [vmem:[#allocation9 + $0x384] ss:$16 sps:$4 sm:$0xff]   ;;  %v3376_v5 = vld [vmem:[#allocation9 + $0x38c] ss:$16 sps:$4 sm:$0xff]   ;;  %v3371_v6 = vld [vmem:[#allocation9 + $0x380] ss:$16 sps:$4 sm:$0xff]  }
 0x273   :  { %v1284_v13 = vpack.c.bf16 %v1280_v11, %v1280_v11  ;;  %v1286_v19 = vpack.c.bf16 %v1282_v12, %v1282_v12  ;;  %v3374_v7 = vld [vmem:[#allocation9 + $0x388] ss:$16 sps:$4 sm:$0xff]   ;;  %v3379_v8 = vld [vmem:[#allocation9 + $0x3a4] ss:$16 sps:$4 sm:$0xff]   ;;  %v3382_v9 = vld [vmem:[#allocation9 + $0x3ac] ss:$16 sps:$4 sm:$0xff]   ;;  %v466_v12 = vrot.slane %v3741_v59, %v3736_v38 }
 0x274   :  { %v3377_v10 = vld [vmem:[#allocation9 + $0x3a0] ss:$16 sps:$4 sm:$0xff]   ;;  %v3380_v11 = vld [vmem:[#allocation9 + $0x3a8] ss:$16 sps:$4 sm:$0xff]  }
 0x275   :  { %2109 = vmatprep.mubr.bf16.mxu0 %v1284_v13  ;;  %2191 = vmatprep.mubr.bf16.mxu1 %v1284_v13  ;;  %v3385_v13 = vld [vmem:[#allocation9 + $0x3c4] ss:$16 sps:$4 sm:$0xff]  }
 0x276   :  { %2110 = vmatmul.mubr.bf16.vlgmr.msra.gmra.mrb[8].mxu0 %v1283_v16  ;;  %2192 = vmatmul.mubr.bf16.vlgmr.msra.gmra.mrb[8].mxu1 %v1283_v16  ;;  %v3386_v16 = vld [vmem:[#allocation9 + $0x3c8] ss:$16 sps:$4 sm:$0xff]   ;;  %v3395_v59 = vld [vmem:[#allocation10 + $0x40] sm:$0xff]  }
 0x277   :  { %2119 = vmatpush1.bf16.msra.mxu0 %v3299_v14  ;;  %2201 = vmatpush1.bf16.msra.mxu1 %v3302_v15  ;;  %v3388_v14 = vld [vmem:[#allocation9 + $0x3cc] ss:$16 sps:$4 sm:$0xff]   ;;  %v3383_v15 = vld [vmem:[#allocation9 + $0x3c0] ss:$16 sps:$4 sm:$0xff]  }
 0x278   :  { %2150 = vmatprep.mubr.bf16.mxu0 %v1286_v19  ;;  %2232 = vmatprep.mubr.bf16.mxu1 %v1286_v19  ;;  %v3394_v19 = vld [vmem:[#allocation9 + $0x3ec] ss:$16 sps:$4 sm:$0xff]  }
 0x279   :  { %2120 = vmatprep.subr.bf16.mxu0 %v3307_v17  ;;  %2202 = vmatprep.subr.bf16.mxu1 %v3310_v18  ;;  %v2954_v17 = vadd.f32 %v3749_v0, %v466_v12  ;;  %v3391_v18 = vld [vmem:[#allocation9 + $0x3e4] ss:$16 sps:$4 sm:$0xff]   ;;  %v3399_v0 = vld [vmem:[#allocation10 + $0x48] sm:$0xff]  }
 0x27b   :  { %2121 = vmatpush1.bf16.msra.mxu0 %v3305_v20  ;;  %2203 = vmatpush1.bf16.msra.mxu1 %v3308_v21  ;;  %v3389_v20 = vld [vmem:[#allocation9 + $0x3e0] ss:$16 sps:$4 sm:$0xff]   ;;  %v3392_v21 = vld [vmem:[#allocation9 + $0x3e8] ss:$16 sps:$4 sm:$0xff]  }
 0x27c   :  { %2122 = vmatprep.subr.bf16.mxu0 %v3313_v26  ;;  %2204 = vmatprep.subr.bf16.mxu1 %v3316_v27  ;;  %v1281_v26 = vmax.f32 %v2954_v17, 0.0  ;;  %v3396_v27 = vld [vmem:[#allocation10 + $0xc0] sm:$0xff]  }
 0x27f   :  { %2123 = vmatpush1.bf16.msra.mxu0 %v3311_v28  ;;  %2205 = vmatpush1.bf16.msra.mxu1 %v3314_v30  ;;  %v3397_v28 = vld [vmem:[#allocation10] sm:$0xff]  }
 0x280   :  { %2124 = vmatprep.subr.bf16.mxu0 %v3319_v31  ;;  %2206 = vmatprep.subr.bf16.mxu1 %v3322_v32  ;;  %v3398_v30 = vld [vmem:[#allocation10 + $0x80] sm:$0xff]   ;;  %v1285_v31 = vpack.c.bf16 %v1281_v26, %v1281_v26  ;;  %v3400_v32 = vld [vmem:[#allocation10 + $0xc8] sm:$0xff]  }
 0x283   :  { %2125 = vmatpush1.bf16.msra.mxu0 %v3317_v33  ;;  %2207 = vmatpush1.bf16.msra.mxu1 %v3320_v34  ;;  %v3401_v33 = vld [vmem:[#allocation10 + $0x8] sm:$0xff]  }
 0x284   :  { %2126 = vmatprep.subr.bf16.mxu0 %v3325_v35  ;;  %2208 = vmatprep.subr.bf16.mxu1 %v3328_v36  ;;  %v3402_v34 = vld [vmem:[#allocation10 + $0x88] sm:$0xff]   ;;  %v3403_v35 = vld [vmem:[#allocation10 + $0x50] sm:$0xff]  }
 0x285   :  { %v3404_v36 = vld [vmem:[#allocation10 + $0xd0] sm:$0xff]  }
 0x287   :  { %2127 = vmatpush1.bf16.msra.mxu0 %v3323_v37  ;;  %2209 = vmatpush1.bf16.msra.mxu1 %v3326_v39  ;;  %v3405_v37 = vld [vmem:[#allocation10 + $0x10] sm:$0xff]  }
 0x288   :  { %2128 = vmatprep.subr.bf16.mxu0 %v3331_v40  ;;  %2210 = vmatprep.subr.bf16.mxu1 %v3334_v42  ;;  %v3406_v39 = vld [vmem:[#allocation10 + $0x90] sm:$0xff]   ;;  %v3407_v40 = vld [vmem:[#allocation10 + $0x58] sm:$0xff]  }
 0x289   :  { %v3408_v42 = vld [vmem:[#allocation10 + $0xd8] sm:$0xff]  }
 0x28b   :  { %2129 = vmatpush1.bf16.msra.mxu0 %v3329_v43  ;;  %2211 = vmatpush1.bf16.msra.mxu1 %v3332_v44  ;;  %v3409_v43 = vld [vmem:[#allocation10 + $0x18] sm:$0xff]  }
 0x28c   :  { %2130 = vmatprep.subr.bf16.mxu0 %v3337_v45  ;;  %2212 = vmatprep.subr.bf16.mxu1 %v3340_v46  ;;  %v3410_v44 = vld [vmem:[#allocation10 + $0x98] sm:$0xff]   ;;  %v3411_v45 = vld [vmem:[#allocation10 + $0x60] sm:$0xff]  }
 0x28d   :  { %v3412_v46 = vld [vmem:[#allocation10 + $0xe0] sm:$0xff]  }
 0x28f   :  { %2131 = vmatpush1.bf16.msra.mxu0 %v3335_v47  ;;  %2213 = vmatpush1.bf16.msra.mxu1 %v3338_v48  ;;  %v3413_v47 = vld [vmem:[#allocation10 + $0x20] sm:$0xff]  }
 0x290   :  { %2132 = vmatprep.subr.bf16.mxu0 %v3343_v22  ;;  %2214 = vmatprep.subr.bf16.mxu1 %v3346_v49  ;;  %v3414_v48 = vld [vmem:[#allocation10 + $0xa0] sm:$0xff]   ;;  %v3415_v22 = vld [vmem:[#allocation10 + $0x68] sm:$0xff]  }
 0x291   :  { %v3416_v49 = vld [vmem:[#allocation10 + $0xe8] sm:$0xff]  }
 0x293   :  { %2133 = vmatpush1.bf16.msra.mxu0 %v3341_v50  ;;  %2215 = vmatpush1.bf16.msra.mxu1 %v3344_v51  ;;  %v3417_v50 = vld [vmem:[#allocation10 + $0x28] sm:$0xff]  }
 0x294   :  { %2134 = vmatprep.subr.bf16.mxu0 %v3349_v52  ;;  %2216 = vmatprep.subr.bf16.mxu1 %v3352_v53  ;;  %v3418_v51 = vld [vmem:[#allocation10 + $0xa8] sm:$0xff]   ;;  %v3419_v52 = vld [vmem:[#allocation10 + $0x70] sm:$0xff]  }
 0x295   :  { %v3420_v53 = vld [vmem:[#allocation10 + $0xf0] sm:$0xff]  }
 0x297   :  { %2135 = vmatpush1.bf16.msra.mxu0 %v3347_v24  ;;  %2217 = vmatpush1.bf16.msra.mxu1 %v3350_v54  ;;  %v3421_v24 = vld [vmem:[#allocation10 + $0x30] sm:$0xff]  }
 0x298   :  { %2136 = vmatprep.subr.bf16.mxu0 %v3355_v55  ;;  %2218 = vmatprep.subr.bf16.mxu1 %v3358_v56  ;;  %v3422_v54 = vld [vmem:[#allocation10 + $0xb0] sm:$0xff]   ;;  %v3423_v55 = vld [vmem:[#allocation10 + $0x78] sm:$0xff]  }
 0x299   :  { %v3424_v56 = vld [vmem:[#allocation10 + $0xf8] sm:$0xff]  }
 0x29b   :  { %2137 = vmatpush1.bf16.msra.mxu0 %v3353_v57  ;;  %2219 = vmatpush1.bf16.msra.mxu1 %v3356_v41  ;;  %v3425_v57 = vld [vmem:[#allocation10 + $0x38] sm:$0xff]  }
 0x29c   :  { %2138 = vmatprep.subr.bf16.mxu0 %v3361_v58  ;;  %2220 = vmatprep.subr.bf16.mxu1 %v3364_v60  ;;  %v3426_v41 = vld [vmem:[#allocation10 + $0xb8] sm:$0xff]  }
 0x29d   :  { %v1415_v58 = vld [vmem:[%s3773_s6] sm:$0xf] }
 0x29e   :  { %v1420_v60 = vrot.slane %v1415_v58, %v3717_v23 }
 0x29f   :  { %2139 = vmatpush1.bf16.msra.mxu0 %v3359_v61  ;;  %2221 = vmatpush1.bf16.msra.mxu1 %v3362_v62  ;;  %v1428_v61 = vrot.slane %v1415_v58, %v3736_v38  ;;  %v1424_v62 = vrot.slane %v1415_v58, %v3722_v25 }
 0x2a0   :  { %2140 = vmatprep.subr.bf16.mxu0 %v3367_v63  ;;  %2222 = vmatprep.subr.bf16.mxu1 %v3370_v1  ;;  %v1432_v63 = vrot.slane %v1415_v58, %v3729_v29 }
 0x2a3   :  { %2141 = vmatpush1.bf16.msra.mxu0 %v3365_v2  ;;  %2223 = vmatpush1.bf16.msra.mxu1 %v3368_v3 }
 0x2a4   :  { %2142 = vmatprep.subr.bf16.mxu0 %v3373_v4  ;;  %2224 = vmatprep.subr.bf16.mxu1 %v3376_v5 }
 0x2a7   :  { %2143 = vmatpush1.bf16.msra.mxu0 %v3371_v6  ;;  %2225 = vmatpush1.bf16.msra.mxu1 %v3374_v7 }
 0x2a8   :  { %2144 = vmatprep.subr.bf16.mxu0 %v3379_v8  ;;  %2226 = vmatprep.subr.bf16.mxu1 %v3382_v9 }
 0x2ab   :  { %2145 = vmatpush1.bf16.msra.mxu0 %v3377_v10  ;;  %2227 = vmatpush1.bf16.msra.mxu1 %v3380_v11 }
 0x2ac   :  { %2146 = vmatprep.subr.bf16.mxu0 %v3385_v13  ;;  %2228 = vmatprep.subr.bf16.mxu1 %v3388_v14 }
 0x2af   :  { %2147 = vmatpush1.bf16.msra.mxu0 %v3383_v15  ;;  %2229 = vmatpush1.bf16.msra.mxu1 %v3386_v16 }
 0x2b0   :  { %2148 = vmatprep.subr.bf16.mxu0 %v3391_v18  ;;  %2230 = vmatprep.subr.bf16.mxu1 %v3394_v19  ;;  %v2875_v19 = vld [vmem:[%s3775_s8] ss:$0 sm:$0xff] }
 0x2b3   :  { %2149 = vmatpush1.bf16.msra.mxu0 %v3389_v20  ;;  %2231 = vmatpush1.bf16.msra.mxu1 %v3392_v21 }
 0x2b4   :  { %2908 = vmatprep.subr.bf16.mxu0 %v3395_v59  ;;  %2930 = vmatprep.subr.bf16.mxu1 %v3396_v27 }
 0x2b6   :  { %2151 = vmatmul.mubr.bf16.vlgmr.msra.gmra.mrb[8].mxu0 %v1285_v31  ;;  %2233 = vmatmul.mubr.bf16.vlgmr.msra.gmra.mrb[8].mxu1 %v1285_v31 }
 0x2b7   :  { %2909 = vmatpush3.bf16.msra.mxu0 %v3397_v28  ;;  %2931 = vmatpush3.bf16.msra.mxu1 %v3398_v30 }
 0x2b8   :  { %2910 = vmatprep.subr.bf16.mxu0 %v3399_v0  ;;  %2932 = vmatprep.subr.bf16.mxu1 %v3400_v32 }
 0x2bb   :  { %2911 = vmatpush3.bf16.msra.mxu0 %v3401_v33  ;;  %2933 = vmatpush3.bf16.msra.mxu1 %v3402_v34 }
 0x2bc   :  { %2912 = vmatprep.subr.bf16.mxu0 %v3403_v35  ;;  %2934 = vmatprep.subr.bf16.mxu1 %v3404_v36 }
 0x2bf   :  { %2913 = vmatpush3.bf16.msra.mxu0 %v3405_v37  ;;  %2935 = vmatpush3.bf16.msra.mxu1 %v3406_v39 }
 0x2c0   :  { %2914 = vmatprep.subr.bf16.mxu0 %v3407_v40  ;;  %2936 = vmatprep.subr.bf16.mxu1 %v3408_v42 }
 0x2c3   :  { %2915 = vmatpush3.bf16.msra.mxu0 %v3409_v43  ;;  %2937 = vmatpush3.bf16.msra.mxu1 %v3410_v44 }
 0x2c4   :  { %2916 = vmatprep.subr.bf16.mxu0 %v3411_v45  ;;  %2938 = vmatprep.subr.bf16.mxu1 %v3412_v46 }
 0x2c7   :  { %2917 = vmatpush3.bf16.msra.mxu0 %v3413_v47  ;;  %2939 = vmatpush3.bf16.msra.mxu1 %v3414_v48 }
 0x2c8   :  { %2918 = vmatprep.subr.bf16.mxu0 %v3415_v22  ;;  %2940 = vmatprep.subr.bf16.mxu1 %v3416_v49 }
 0x2cb   :  { %2919 = vmatpush3.bf16.msra.mxu0 %v3417_v50  ;;  %2941 = vmatpush3.bf16.msra.mxu1 %v3418_v51 }
 0x2cc   :  { %2920 = vmatprep.subr.bf16.mxu0 %v3419_v52  ;;  %2942 = vmatprep.subr.bf16.mxu1 %v3420_v53 }
 0x2cf   :  { %2921 = vmatpush3.bf16.msra.mxu0 %v3421_v24  ;;  %2943 = vmatpush3.bf16.msra.mxu1 %v3422_v54 }
 0x2d0   :  { %2922 = vmatprep.subr.bf16.mxu0 %v3423_v55  ;;  %2944 = vmatprep.subr.bf16.mxu1 %v3424_v56 }
 0x2d3   :  { %2923 = vmatpush3.bf16.msra.mxu0 %v3425_v57  ;;  %2945 = vmatpush3.bf16.msra.mxu1 %v3426_v41 }
 0x389   :  { %v2152_v1 = vpop.f32.mrb[8].mxu0  ;;  %v2234_v2 = vpop.f32.mrb[8].mxu1 }
 0x38a   :  { %v2956_v3 = vadd.f32 %v2152_v1, %v1420_v60  ;;  %v2958_v4 = vadd.f32 %v2234_v2, %v1428_v61  ;;  %v2154_v5 = vpop.f32.mrb[9].mxu0  ;;  %v2236_v6 = vpop.f32.mrb[9].mxu1 }
 0x38b   :  { %v2957_v7 = vadd.f32 %v2154_v5, %v1424_v62  ;;  %v2959_v8 = vadd.f32 %v2236_v6, %v1432_v63  ;;  %v2156_v9 = vpop.f32.mrb[10].mxu0  ;;  %v2238_v10 = vpop.f32.mrb[10].mxu1 }
 0x38c   :  { %v2241_v11 = vmax.f32 %v2956_v3, 0.0  ;;  %v2243_v12 = vmax.f32 %v2958_v4, 0.0  ;;  %v2157_v13 = vpop.f32.mrb[11].mxu0  ;;  %v2239_v23 = vpop.f32.mrb[11].mxu1 }
 0x38d   :  { %v2242_v14 = vmax.f32 %v2957_v7, 0.0  ;;  %v2244_v38 = vmax.f32 %v2959_v8, 0.0 }
 0x38e   :  { %v2245_v16 = vpack.c.bf16 %v2241_v11, %v2241_v11  ;;  %v2247_v29 = vpack.c.bf16 %v2243_v12, %v2243_v12 }
 0x38f   :  { %v2246_v15 = vpack.c.bf16 %v2242_v14, %v2242_v14  ;;  %v2248_v25 = vpack.c.bf16 %v2244_v38, %v2244_v38 }
 0x391   :  { %2544 = vmatprep.mubr.bf16.mxu0 %v2246_v15  ;;  %2584 = vmatprep.mubr.bf16.mxu1 %v2248_v25 }
 0x392   :  { %2545 = vmatmul.mubr.bf16.vlgmr.msra.gmra.mrb[12].mxu0 %v2245_v16  ;;  %2585 = vmatmul.mubr.bf16.vlgmr.msra.gmra.mrb[12].mxu1 %v2247_v29 }
 0x465   :  { %v2924_v17 = vpop.f32.mrb[12].mxu0  ;;  %v2946_v18 = vpop.f32.mrb[12].mxu1 }
 0x466   :  { %v2925_v20 = vpop.f32.mrb[13].mxu0  ;;  %v2947_v21 = vpop.f32.mrb[13].mxu1 }
 0x467   :  { %v2926_v26 = vadd.f32 %v2925_v20, %v2924_v17  ;;  %v2948_v59 = vadd.f32 %v2947_v21, %v2946_v18  ;;  %v2927_v27 = vpop.f32.mrb[14].mxu0  ;;  %v2949_v28 = vpop.f32.mrb[14].mxu1 }
 0x468   :  { %v2928_v30 = vpop.f32.mrb[15].mxu0  ;;  %v2950_v31 = vpop.f32.mrb[15].mxu1 }
 0x469   :  { %v2547_v0 = vadd.f32 %v2926_v26, %v2875_v19 }
 0x46b   :  { %v2587_v32 = vadd.f32 %v2948_v59, %v2547_v0 }
 0x46d   :  { %2592 = vst [vmem:[%s3776_s9] sm:$0x3] %v2587_v32 }
 0x46e   :  { %2597 = vsyncpa [#allocation3], 1 }
 0x46f   :  { %2598 = vsyncpa [#allocation5], 1 }
 0x470   :  { %2599 = vsyncpa [#allocation8], 1 }
 0x471   :  { %2600 = vsyncpa [#allocation11], 1 }

</bundles_post_ra>
